<compile_context>
chip_gen: v7x
topology: tpu7x:2x2x1
jax: 0.10.0
libtpu: 0.0.40
codegen_flags: <defaults>
</compile_context>

<pallas_src>
import functools

import jax
import jax.numpy as jnp
from jax import lax
from jax.experimental import pallas as pl
from jax.experimental.pallas import tpu as pltpu

EPS = 1e-5  # PyTorch InstanceNorm2d default


def _ru8(n):
    return ((n + 7) // 8) * 8


def _mean_hw(t):
    # Mean over the trailing two (spatial) axes, keepdims, done as two 1-D
    # reductions (lane reduce then sublane reduce) for robust lowering.
    return jnp.mean(jnp.mean(t, axis=2, keepdims=True), axis=1, keepdims=True)


def _resblock_kernel(x_ref, wb_ref, b_ref, o_ref, pad_ref, *, C, H, W, HI, HO):
    # x_ref : (1, C, H, W)             input image (also used for the residual)
    # wb_ref: (3, C*HO, C*HI)   VMEM   banded conv weights (one slab per dj tap)
    # b_ref : (C, 1, 1)         VMEM   conv bias
    # o_ref : (1, C, H, W)
    # pad_ref: (C, HI, W+4)     VMEM   scratch for the doubly reflection-padded map
    Hp, Wp = H + 2, W + 2          # singly-padded size == 'valid' conv output size
    Win = W + 4                    # doubly-padded width

    x = x_ref[0].astype(jnp.float32)                       # (C, H, W)

    # ---- ReflectionPad2d(1) applied twice, built entirely in VMEM.
    # pad1(pad1(x)) duplicates the first/last two rows and columns:
    #   rows: [x0, x1] ++ x[0:H] ++ [x_{H-2}, x_{H-1}]   (same pattern for cols)
    pad_ref[...] = jnp.zeros((C, HI, Win), jnp.float32)    # keep tail pad rows finite
    row_bands = ((0, 2, 0, 2), (2, H + 2, 0, H), (H + 2, H + 4, H - 2, H))
    col_bands = ((0, 2, 0, 2), (2, W + 2, 0, W), (W + 2, W + 4, W - 2, W))
    for rd0, rd1, rs0, rs1 in row_bands:
        for cd0, cd1, cs0, cs1 in col_bands:
            pad_ref[:, rd0:rd1, cd0:cd1] = x[:, rs0:rs1, cs0:cs1]
    xpp = pad_ref[...]                                     # (C, HI, W+4)

    # ---- InstanceNorm2d #1 + ReLU, vectorized over channels.
    # Stats are taken over the singly-padded region (what PyTorch's IN sees
    # after the first ReflectionPad); applying them elementwise to the doubly
    # padded map reproduces pad1(relu(IN(pad1(x)))) exactly, since reflection
    # padding is pure index replication.
    sp = xpp[:, 1:H + 3, 1:W + 3]                          # (C, H+2, W+2)
    m1 = _mean_hw(sp)
    v1 = _mean_hw((sp - m1) * (sp - m1))                   # biased variance
    y = jnp.maximum((xpp - m1) * lax.rsqrt(v1 + EPS), 0.0)  # (C, HI, W+4)

    # ---- 3x3 'valid' Conv2d on the MXU.
    # Channel mixing + vertical taps are folded into banded weight matrices;
    # the three horizontal taps are three lane-shifted slices of the rhs.
    # HI/HO are multiples of 8, so both reshapes below are tile-aligned.
    # TODO(synk): cast operands to bf16 (f32 accumulate) on v6e/v7x for extra
    # MXU throughput; kept f32 here to hold the tight correctness tolerance.
    rhs = y.reshape(C * HI, Win)                           # layout-trivial collapse
    acc = jnp.dot(wb_ref[0], rhs[:, 0:Wp], preferred_element_type=jnp.float32)
    acc = acc + jnp.dot(wb_ref[1], rhs[:, 1:Wp + 1], preferred_element_type=jnp.float32)
    acc = acc + jnp.dot(wb_ref[2], rhs[:, 2:Wp + 2], preferred_element_type=jnp.float32)
    z = acc.reshape(C, HO, Wp) + b_ref[...]                # (C, HO, Wp)

    # ---- InstanceNorm2d #2 over the full (H+2, W+2) conv output.
    zv = z[:, :Hp, :]
    m2 = _mean_hw(zv)
    v2 = _mean_hw((zv - m2) * (zv - m2))
    inv2 = lax.rsqrt(v2 + EPS)

    # TODO(synk): the original `x + self.conv(x)` is ill-formed ((H,W) vs
    # (H+2,W+2)) and raises in PyTorch; we center-crop the branch to (H, W).
    zn = (z[:, 1:H + 1, 1:W + 1] - m2) * inv2              # (C, H, W)
    o_ref[0] = (x + zn).astype(o_ref.dtype)


def _banded_weights(w, H, HI, HO):
    # w: (Cout, Cin, 3, 3) OIHW.  Returns (3, Cout*HO, Cin*HI) f32 where slice
    # dj is a banded (Toeplitz over rows) matrix:
    #   Wb[dj][o*HO + i, c*HI + r] = w[o, c, r - i, dj]  for 0 <= r-i < 3, i < H+2
    # Rows i >= H+2 and columns r >= H+4 are zero (tile padding).
    Hp = H + 2
    Co, Ci = w.shape[0], w.shape[1]
    w = w.astype(jnp.float32)
    row_mask = (jnp.arange(HO) < Hp).astype(jnp.float32)[:, None]
    bands = []
    for dj in range(3):
        m = jnp.zeros((Co * HO, Ci * HI), jnp.float32)
        for di in range(3):
            band = jnp.eye(HO, HI, k=di, dtype=jnp.float32) * row_mask
            m = m + jnp.kron(w[:, :, di, dj], band)
        bands.append(m)
    return jnp.stack(bands, axis=0)


def resblock_forward(x, w, b):
    N, C, H, W = x.shape
    HI = _ru8(H + 4)   # padded-input rows per channel inside the GEMM
    HO = _ru8(H + 2)   # conv-output rows per channel inside the GEMM
    wb = _banded_weights(w, H, HI, HO)                # (3, C*HO, C*HI), VMEM
    b3 = b.reshape(C, 1, 1).astype(jnp.float32)

    kernel = functools.partial(_resblock_kernel, C=C, H=H, W=W, HI=HI, HO=HO)
    return pl.pallas_call(
        kernel,
        out_shape=jax.ShapeDtypeStruct((N, C, H, W), x.dtype),
        grid_spec=pltpu.PrefetchScalarGridSpec(
            num_scalar_prefetch=0,
            grid=(N,),
            in_specs=[
                pl.BlockSpec((1, C, H, W), lambda n: (n, 0, 0, 0)),
                pl.BlockSpec((3, C * HO, C * HI), lambda n: (0, 0, 0)),
                pl.BlockSpec((C, 1, 1), lambda n: (0, 0, 0)),
            ],
            out_specs=pl.BlockSpec((1, C, H, W), lambda n: (n, 0, 0, 0)),
            scratch_shapes=[pltpu.VMEM((C, HI, W + 4), jnp.float32)],
        ),
        compiler_params=pltpu.CompilerParams(dimension_semantics=("parallel",)),
    )(x, wb, b3)


def _reflect_pad1(t):
    return jnp.pad(t, ((0, 0), (0, 0), (1, 1), (1, 1)), mode="reflect")


def resblock_ref(x, w, b):
    # Pure-JAX reference of the same (crop-fixed) semantics.
    p1 = _reflect_pad1(x)
    m = p1.mean(axis=(2, 3), keepdims=True)
    v = ((p1 - m) ** 2).mean(axis=(2, 3), keepdims=True)
    y = jax.nn.relu((p1 - m) / jnp.sqrt(v + EPS))
    y2 = _reflect_pad1(y)
    z = lax.conv_general_dilated(
        y2, w, window_strides=(1, 1), padding="VALID",
        dimension_numbers=("NCHW", "OIHW", "NCHW"),
        precision=lax.Precision.HIGHEST,
    ) + b[None, :, None, None]
    m2 = z.mean(axis=(2, 3), keepdims=True)
    v2 = ((z - m2) ** 2).mean(axis=(2, 3), keepdims=True)
    zn = (z - m2) / jnp.sqrt(v2 + EPS)
    return x + zn[:, :, 1:-1, 1:-1]


if __name__ == "__main__":
    key = jax.random.PRNGKey(0)
    kx, kw, kb = jax.random.split(key, 3)

    N, C, H, W = 2, 4, 16, 16
    x = jax.random.normal(kx, (N, C, H, W), dtype=jnp.float32)

    # Deterministic Conv2d(in=C, out=C, k=3) params (uniform in +-1/sqrt(fan_in)).
    bound = 1.0 / (C * 9.0) ** 0.5
    w = jax.random.uniform(kw, (C, C, 3, 3), jnp.float32, -bound, bound)
    b = jax.random.uniform(kb, (C,), jnp.float32, -bound, bound)

    out = jax.block_until_ready(resblock_forward(x, w, b))
    ref = jax.block_until_ready(resblock_ref(x, w, b))

    assert out.shape == (N, C, H, W)
    assert jnp.allclose(out, ref, rtol=1e-3, atol=1e-3), "mismatch vs JAX reference"
    print("KERNEL_OK")
</pallas_src>

<mosaic_0001>
module attributes {stable_mosaic.version = 11 : i64} {
  func.func @_resblock_kernel(%arg0: i32, %arg1: memref<1x4x16x16xf32, #tpu.memory_space<vmem>>, %arg2: memref<3x96x96xf32, #tpu.memory_space<vmem>>, %arg3: memref<4x1x1xf32, #tpu.memory_space<vmem>>, %arg4: memref<1x4x16x16xf32, #tpu.memory_space<vmem>>, %arg5: memref<4x24x20xf32, #tpu.memory_space<vmem>>) attributes {dimension_semantics = [#tpu.dimension_semantics<parallel>], iteration_bounds = array<i64: 2>, scalar_prefetch = 0 : i64, scratch_operands = 1 : i64, tpu.core_type = #tpu.core_type<tc>, window_params = [{transform_indices = @transform_0, window_bounds = array<i64: 1, 4, 16, 16>}, {pipeline_mode = #tpu.pipeline_mode<synchronous>, transform_indices = @transform_1, window_bounds = array<i64: 3, 96, 96>}, {pipeline_mode = #tpu.pipeline_mode<synchronous>, transform_indices = @transform_2, window_bounds = array<i64: 4, 1, 1>}, {transform_indices = @transform_3, window_bounds = array<i64: 1, 4, 16, 16>}]} {
    %c0 = arith.constant 0 : index
    %c0_0 = arith.constant 0 : index
    %c0_1 = arith.constant 0 : index
    %c0_2 = arith.constant 0 : index
    %0 = vector.load %arg1[%c0, %c0_0, %c0_1, %c0_2] : memref<1x4x16x16xf32, #tpu.memory_space<vmem>>, vector<1x4x16x16xf32>
    %1 = vector.shape_cast %0 : vector<1x4x16x16xf32> to vector<4x16x16xf32>
    %cst = arith.constant 0.000000e+00 : f32
    %2 = vector.broadcast %cst : f32 to vector<4x24x20xf32>
    %c0_3 = arith.constant 0 : index
    %c0_4 = arith.constant 0 : index
    %c0_5 = arith.constant 0 : index
    %3 = vector.load %arg5[%c0_3, %c0_4, %c0_5] : memref<4x24x20xf32, #tpu.memory_space<vmem>>, vector<4x24x20xf32>
    tpu.vector_store %arg5[%c0_3, %c0_4, %c0_5], %2 {strides = array<i32>} : memref<4x24x20xf32, #tpu.memory_space<vmem>>, vector<4x24x20xf32>,
    %4 = vector.extract_strided_slice %1 {offsets = [0, 0, 0], sizes = [4, 2, 2], strides = [1, 1, 1]} : vector<4x16x16xf32> to vector<4x2x2xf32>
    %c0_6 = arith.constant 0 : index
    %c0_7 = arith.constant 0 : index
    %c0_8 = arith.constant 0 : index
    %5 = vector.load %arg5[%c0_6, %c0_7, %c0_8] : memref<4x24x20xf32, #tpu.memory_space<vmem>>, vector<4x2x2xf32>
    tpu.vector_store %arg5[%c0_6, %c0_7, %c0_8], %4 {strides = array<i32>} : memref<4x24x20xf32, #tpu.memory_space<vmem>>, vector<4x2x2xf32>,
    %6 = vector.extract_strided_slice %1 {offsets = [0, 0, 0], sizes = [4, 2, 16], strides = [1, 1, 1]} : vector<4x16x16xf32> to vector<4x2x16xf32>
    %c0_9 = arith.constant 0 : index
    %c0_10 = arith.constant 0 : index
    %c2 = arith.constant 2 : index
    %7 = vector.load %arg5[%c0_9, %c0_10, %c2] : memref<4x24x20xf32, #tpu.memory_space<vmem>>, vector<4x2x16xf32>
    tpu.vector_store %arg5[%c0_9, %c0_10, %c2], %6 {strides = array<i32>} : memref<4x24x20xf32, #tpu.memory_space<vmem>>, vector<4x2x16xf32>,
    %8 = vector.extract_strided_slice %1 {offsets = [0, 0, 14], sizes = [4, 2, 2], strides = [1, 1, 1]} : vector<4x16x16xf32> to vector<4x2x2xf32>
    %c0_11 = arith.constant 0 : index
    %c0_12 = arith.constant 0 : index
    %c18 = arith.constant 18 : index
    %9 = vector.load %arg5[%c0_11, %c0_12, %c18] : memref<4x24x20xf32, #tpu.memory_space<vmem>>, vector<4x2x2xf32>
    tpu.vector_store %arg5[%c0_11, %c0_12, %c18], %8 {strides = array<i32>} : memref<4x24x20xf32, #tpu.memory_space<vmem>>, vector<4x2x2xf32>,
    %10 = vector.extract_strided_slice %1 {offsets = [0, 0, 0], sizes = [4, 16, 2], strides = [1, 1, 1]} : vector<4x16x16xf32> to vector<4x16x2xf32>
    %c0_13 = arith.constant 0 : index
    %c2_14 = arith.constant 2 : index
    %c0_15 = arith.constant 0 : index
    %11 = vector.load %arg5[%c0_13, %c2_14, %c0_15] : memref<4x24x20xf32, #tpu.memory_space<vmem>>, vector<4x16x2xf32>
    tpu.vector_store %arg5[%c0_13, %c2_14, %c0_15], %10 {strides = array<i32>} : memref<4x24x20xf32, #tpu.memory_space<vmem>>, vector<4x16x2xf32>,
    %c0_16 = arith.constant 0 : index
    %c2_17 = arith.constant 2 : index
    %c2_18 = arith.constant 2 : index
    %12 = vector.load %arg5[%c0_16, %c2_17, %c2_18] : memref<4x24x20xf32, #tpu.memory_space<vmem>>, vector<4x16x16xf32>
    tpu.vector_store %arg5[%c0_16, %c2_17, %c2_18], %1 {strides = array<i32>} : memref<4x24x20xf32, #tpu.memory_space<vmem>>, vector<4x16x16xf32>,
    %13 = vector.extract_strided_slice %1 {offsets = [0, 0, 14], sizes = [4, 16, 2], strides = [1, 1, 1]} : vector<4x16x16xf32> to vector<4x16x2xf32>
    %c0_19 = arith.constant 0 : index
    %c2_20 = arith.constant 2 : index
    %c18_21 = arith.constant 18 : index
    %14 = vector.load %arg5[%c0_19, %c2_20, %c18_21] : memref<4x24x20xf32, #tpu.memory_space<vmem>>, vector<4x16x2xf32>
    tpu.vector_store %arg5[%c0_19, %c2_20, %c18_21], %13 {strides = array<i32>} : memref<4x24x20xf32, #tpu.memory_space<vmem>>, vector<4x16x2xf32>,
    %15 = vector.extract_strided_slice %1 {offsets = [0, 14, 0], sizes = [4, 2, 2], strides = [1, 1, 1]} : vector<4x16x16xf32> to vector<4x2x2xf32>
    %c0_22 = arith.constant 0 : index
    %c18_23 = arith.constant 18 : index
    %c0_24 = arith.constant 0 : index
    %16 = vector.load %arg5[%c0_22, %c18_23, %c0_24] : memref<4x24x20xf32, #tpu.memory_space<vmem>>, vector<4x2x2xf32>
    tpu.vector_store %arg5[%c0_22, %c18_23, %c0_24], %15 {strides = array<i32>} : memref<4x24x20xf32, #tpu.memory_space<vmem>>, vector<4x2x2xf32>,
    %17 = vector.extract_strided_slice %1 {offsets = [0, 14, 0], sizes = [4, 2, 16], strides = [1, 1, 1]} : vector<4x16x16xf32> to vector<4x2x16xf32>
    %c0_25 = arith.constant 0 : index
    %c18_26 = arith.constant 18 : index
    %c2_27 = arith.constant 2 : index
    %18 = vector.load %arg5[%c0_25, %c18_26, %c2_27] : memref<4x24x20xf32, #tpu.memory_space<vmem>>, vector<4x2x16xf32>
    tpu.vector_store %arg5[%c0_25, %c18_26, %c2_27], %17 {strides = array<i32>} : memref<4x24x20xf32, #tpu.memory_space<vmem>>, vector<4x2x16xf32>,
    %19 = vector.extract_strided_slice %1 {offsets = [0, 14, 14], sizes = [4, 2, 2], strides = [1, 1, 1]} : vector<4x16x16xf32> to vector<4x2x2xf32>
    %c0_28 = arith.constant 0 : index
    %c18_29 = arith.constant 18 : index
    %c18_30 = arith.constant 18 : index
    %20 = vector.load %arg5[%c0_28, %c18_29, %c18_30] : memref<4x24x20xf32, #tpu.memory_space<vmem>>, vector<4x2x2xf32>
    tpu.vector_store %arg5[%c0_28, %c18_29, %c18_30], %19 {strides = array<i32>} : memref<4x24x20xf32, #tpu.memory_space<vmem>>, vector<4x2x2xf32>,
    %c0_31 = arith.constant 0 : index
    %c0_32 = arith.constant 0 : index
    %c0_33 = arith.constant 0 : index
    %21 = vector.load %arg5[%c0_31, %c0_32, %c0_33] : memref<4x24x20xf32, #tpu.memory_space<vmem>>, vector<4x24x20xf32>
    %22 = vector.extract_strided_slice %21 {offsets = [0, 1, 1], sizes = [4, 18, 18], strides = [1, 1, 1]} : vector<4x24x20xf32> to vector<4x18x18xf32>
    %cst_34 = arith.constant dense<0.000000e+00> : vector<4x18xf32>
    %23 = vector.multi_reduction <add>, %22, %cst_34 [2] : vector<4x18x18xf32> to vector<4x18xf32>
    %24 = vector.shape_cast %23 : vector<4x18xf32> to vector<4x18x1xf32>
    %cst_35 = arith.constant 1.800000e+01 : f32
    %25 = vector.broadcast %cst_35 : f32 to vector<4x18x1xf32>
    %26 = arith.divf %24, %25 : vector<4x18x1xf32>
    %cst_36 = arith.constant dense<0.000000e+00> : vector<4x1xf32>
    %27 = vector.multi_reduction <add>, %26, %cst_36 [1] : vector<4x18x1xf32> to vector<4x1xf32>
    %28 = vector.shape_cast %27 : vector<4x1xf32> to vector<4x1x1xf32>
    %cst_37 = arith.constant 1.800000e+01 : f32
    %29 = vector.broadcast %cst_37 : f32 to vector<4x1x1xf32>
    %30 = arith.divf %28, %29 : vector<4x1x1xf32>
    %31 = vector.broadcast %30 : vector<4x1x1xf32> to vector<4x18x18xf32>
    %32 = arith.subf %22, %31 : vector<4x18x18xf32>
    %33 = vector.broadcast %30 : vector<4x1x1xf32> to vector<4x18x18xf32>
    %34 = arith.subf %22, %33 : vector<4x18x18xf32>
    %35 = arith.mulf %32, %34 : vector<4x18x18xf32>
    %cst_38 = arith.constant dense<0.000000e+00> : vector<4x18xf32>
    %36 = vector.multi_reduction <add>, %35, %cst_38 [2] : vector<4x18x18xf32> to vector<4x18xf32>
    %37 = vector.shape_cast %36 : vector<4x18xf32> to vector<4x18x1xf32>
    %cst_39 = arith.constant 1.800000e+01 : f32
    %38 = vector.broadcast %cst_39 : f32 to vector<4x18x1xf32>
    %39 = arith.divf %37, %38 : vector<4x18x1xf32>
    %cst_40 = arith.constant dense<0.000000e+00> : vector<4x1xf32>
    %40 = vector.multi_reduction <add>, %39, %cst_40 [1] : vector<4x18x1xf32> to vector<4x1xf32>
    %41 = vector.shape_cast %40 : vector<4x1xf32> to vector<4x1x1xf32>
    %cst_41 = arith.constant 1.800000e+01 : f32
    %42 = vector.broadcast %cst_41 : f32 to vector<4x1x1xf32>
    %43 = arith.divf %41, %42 : vector<4x1x1xf32>
    %44 = vector.broadcast %30 : vector<4x1x1xf32> to vector<4x24x20xf32>
    %45 = arith.subf %21, %44 : vector<4x24x20xf32>
    %cst_42 = arith.constant 9.99999974E-6 : f32
    %46 = vector.broadcast %cst_42 : f32 to vector<4x1x1xf32>
    %47 = arith.addf %43, %46 : vector<4x1x1xf32>
    %48 = math.rsqrt %47 : vector<4x1x1xf32>
    %49 = vector.broadcast %48 : vector<4x1x1xf32> to vector<4x24x20xf32>
    %50 = arith.mulf %45, %49 : vector<4x24x20xf32>
    %cst_43 = arith.constant 0.000000e+00 : f32
    %51 = vector.broadcast %cst_43 : f32 to vector<4x24x20xf32>
    %52 = arith.maximumf %50, %51 : vector<4x24x20xf32>
    %53 = vector.shape_cast %52 : vector<4x24x20xf32> to vector<96x20xf32>
    %c0_44 = arith.constant 0 : index
    %c0_45 = arith.constant 0 : index
    %c0_46 = arith.constant 0 : index
    %54 = vector.load %arg2[%c0_44, %c0_45, %c0_46] : memref<3x96x96xf32, #tpu.memory_space<vmem>>, vector<1x96x96xf32>
    %55 = vector.shape_cast %54 : vector<1x96x96xf32> to vector<96x96xf32>
    %56 = vector.extract_strided_slice %53 {offsets = [0, 0], sizes = [96, 18], strides = [1, 1]} : vector<96x20xf32> to vector<96x18xf32>
    %cst_47 = arith.constant dense<0.000000e+00> : vector<96x18xf32>
    %57 = tpu.matmul %55, %56, %cst_47 {dimension_numbers = #tpu.dot_dimension_numbers<[1], [0], [0], [1], [0, 0, 1, 1], [], []>} : vector<96x96xf32>, vector<96x18xf32>, vector<96x18xf32> -> vector<96x18xf32>
    %c1 = arith.constant 1 : index
    %c0_48 = arith.constant 0 : index
    %c0_49 = arith.constant 0 : index
    %58 = vector.load %arg2[%c1, %c0_48, %c0_49] : memref<3x96x96xf32, #tpu.memory_space<vmem>>, vector<1x96x96xf32>
    %59 = vector.shape_cast %58 : vector<1x96x96xf32> to vector<96x96xf32>
    %60 = vector.extract_strided_slice %53 {offsets = [0, 1], sizes = [96, 18], strides = [1, 1]} : vector<96x20xf32> to vector<96x18xf32>
    %cst_50 = arith.constant dense<0.000000e+00> : vector<96x18xf32>
    %61 = tpu.matmul %59, %60, %cst_50 {dimension_numbers = #tpu.dot_dimension_numbers<[1], [0], [0], [1], [0, 0, 1, 1], [], []>} : vector<96x96xf32>, vector<96x18xf32>, vector<96x18xf32> -> vector<96x18xf32>
    %62 = arith.addf %57, %61 : vector<96x18xf32>
    %c2_51 = arith.constant 2 : index
    %c0_52 = arith.constant 0 : index
    %c0_53 = arith.constant 0 : index
    %63 = vector.load %arg2[%c2_51, %c0_52, %c0_53] : memref<3x96x96xf32, #tpu.memory_space<vmem>>, vector<1x96x96xf32>
    %64 = vector.shape_cast %63 : vector<1x96x96xf32> to vector<96x96xf32>
    %65 = vector.extract_strided_slice %53 {offsets = [0, 2], sizes = [96, 18], strides = [1, 1]} : vector<96x20xf32> to vector<96x18xf32>
    %cst_54 = arith.constant dense<0.000000e+00> : vector<96x18xf32>
    %66 = tpu.matmul %64, %65, %cst_54 {dimension_numbers = #tpu.dot_dimension_numbers<[1], [0], [0], [1], [0, 0, 1, 1], [], []>} : vector<96x96xf32>, vector<96x18xf32>, vector<96x18xf32> -> vector<96x18xf32>
    %67 = arith.addf %62, %66 : vector<96x18xf32>
    %68 = vector.shape_cast %67 : vector<96x18xf32> to vector<4x24x18xf32>
    %c0_55 = arith.constant 0 : index
    %c0_56 = arith.constant 0 : index
    %c0_57 = arith.constant 0 : index
    %69 = vector.load %arg3[%c0_55, %c0_56, %c0_57] : memref<4x1x1xf32, #tpu.memory_space<vmem>>, vector<4x1x1xf32>
    %70 = vector.broadcast %69 : vector<4x1x1xf32> to vector<4x24x18xf32>
    %71 = arith.addf %68, %70 : vector<4x24x18xf32>
    %72 = vector.extract_strided_slice %71 {offsets = [0, 0, 0], sizes = [4, 18, 18], strides = [1, 1, 1]} : vector<4x24x18xf32> to vector<4x18x18xf32>
    %cst_58 = arith.constant dense<0.000000e+00> : vector<4x18xf32>
    %73 = vector.multi_reduction <add>, %72, %cst_58 [2] : vector<4x18x18xf32> to vector<4x18xf32>
    %74 = vector.shape_cast %73 : vector<4x18xf32> to vector<4x18x1xf32>
    %cst_59 = arith.constant 1.800000e+01 : f32
    %75 = vector.broadcast %cst_59 : f32 to vector<4x18x1xf32>
    %76 = arith.divf %74, %75 : vector<4x18x1xf32>
    %cst_60 = arith.constant dense<0.000000e+00> : vector<4x1xf32>
    %77 = vector.multi_reduction <add>, %76, %cst_60 [1] : vector<4x18x1xf32> to vector<4x1xf32>
    %78 = vector.shape_cast %77 : vector<4x1xf32> to vector<4x1x1xf32>
    %cst_61 = arith.constant 1.800000e+01 : f32
    %79 = vector.broadcast %cst_61 : f32 to vector<4x1x1xf32>
    %80 = arith.divf %78, %79 : vector<4x1x1xf32>
    %81 = vector.broadcast %80 : vector<4x1x1xf32> to vector<4x18x18xf32>
    %82 = arith.subf %72, %81 : vector<4x18x18xf32>
    %83 = vector.broadcast %80 : vector<4x1x1xf32> to vector<4x18x18xf32>
    %84 = arith.subf %72, %83 : vector<4x18x18xf32>
    %85 = arith.mulf %82, %84 : vector<4x18x18xf32>
    %cst_62 = arith.constant dense<0.000000e+00> : vector<4x18xf32>
    %86 = vector.multi_reduction <add>, %85, %cst_62 [2] : vector<4x18x18xf32> to vector<4x18xf32>
    %87 = vector.shape_cast %86 : vector<4x18xf32> to vector<4x18x1xf32>
    %cst_63 = arith.constant 1.800000e+01 : f32
    %88 = vector.broadcast %cst_63 : f32 to vector<4x18x1xf32>
    %89 = arith.divf %87, %88 : vector<4x18x1xf32>
    %cst_64 = arith.constant dense<0.000000e+00> : vector<4x1xf32>
    %90 = vector.multi_reduction <add>, %89, %cst_64 [1] : vector<4x18x1xf32> to vector<4x1xf32>
    %91 = vector.shape_cast %90 : vector<4x1xf32> to vector<4x1x1xf32>
    %cst_65 = arith.constant 1.800000e+01 : f32
    %92 = vector.broadcast %cst_65 : f32 to vector<4x1x1xf32>
    %93 = arith.divf %91, %92 : vector<4x1x1xf32>
    %cst_66 = arith.constant 9.99999974E-6 : f32
    %94 = vector.broadcast %cst_66 : f32 to vector<4x1x1xf32>
    %95 = arith.addf %93, %94 : vector<4x1x1xf32>
    %96 = math.rsqrt %95 : vector<4x1x1xf32>
    %97 = vector.extract_strided_slice %71 {offsets = [0, 1, 1], sizes = [4, 16, 16], strides = [1, 1, 1]} : vector<4x24x18xf32> to vector<4x16x16xf32>
    %98 = vector.broadcast %80 : vector<4x1x1xf32> to vector<4x16x16xf32>
    %99 = arith.subf %97, %98 : vector<4x16x16xf32>
    %100 = vector.broadcast %96 : vector<4x1x1xf32> to vector<4x16x16xf32>
    %101 = arith.mulf %99, %100 : vector<4x16x16xf32>
    %102 = arith.addf %1, %101 : vector<4x16x16xf32>
    %c0_67 = arith.constant 0 : index
    %c0_68 = arith.constant 0 : index
    %c0_69 = arith.constant 0 : index
    %c0_70 = arith.constant 0 : index
    %103 = vector.load %arg4[%c0_67, %c0_68, %c0_69, %c0_70] : memref<1x4x16x16xf32, #tpu.memory_space<vmem>>, vector<1x4x16x16xf32>
    %104 = vector.shape_cast %103 : vector<1x4x16x16xf32> to vector<4x16x16xf32>
    %105 = vector.shape_cast %102 : vector<4x16x16xf32> to vector<1x4x16x16xf32>
    tpu.vector_store %arg4[%c0_67, %c0_68, %c0_69, %c0_70], %105 {strides = array<i32>} : memref<1x4x16x16xf32, #tpu.memory_space<vmem>>, vector<1x4x16x16xf32>,
    return
  }
  func.func @transform_0(%arg0: i32) -> (i32, i32, i32, i32) {
    %c0_i32 = arith.constant 0 : i32
    %c0_i32_0 = arith.constant 0 : i32
    %c0_i32_1 = arith.constant 0 : i32
    %c0_i32_2 = arith.constant 0 : i32
    return %arg0, %c0_i32, %c0_i32_0, %c0_i32_1 : i32, i32, i32, i32
  }
  func.func @transform_1(%arg0: i32) -> (i32, i32, i32) {
    %c0_i32 = arith.constant 0 : i32
    %c0_i32_0 = arith.constant 0 : i32
    %c0_i32_1 = arith.constant 0 : i32
    %c0_i32_2 = arith.constant 0 : i32
    return %c0_i32, %c0_i32_0, %c0_i32_1 : i32, i32, i32
  }
  func.func @transform_2(%arg0: i32) -> (i32, i32, i32) {
    %c0_i32 = arith.constant 0 : i32
    %c0_i32_0 = arith.constant 0 : i32
    %c0_i32_1 = arith.constant 0 : i32
    %c0_i32_2 = arith.constant 0 : i32
    return %c0_i32, %c0_i32_0, %c0_i32_1 : i32, i32, i32
  }
  func.func @transform_3(%arg0: i32) -> (i32, i32, i32, i32) {
    %c0_i32 = arith.constant 0 : i32
    %c0_i32_0 = arith.constant 0 : i32
    %c0_i32_1 = arith.constant 0 : i32
    %c0_i32_2 = arith.constant 0 : i32
    return %arg0, %c0_i32, %c0_i32_0, %c0_i32_1 : i32, i32, i32, i32
  }
}

</mosaic_0001>

<bundles_post_ra>
// kernel: tpu_custom_call.1
= control target key start
LH: loop header
LB: loop body
LE: loop exit
PB: predicated region body
PF: predicated region fallthrough
CT: control target
= control target key end

     0   :  { %8 = vsyncpa [#allocation4], 0  ;;  %s3248_s0 = inlined_call_operand.hbm [shape: f32[2,4,16,16], index: 0, kind: input, shape index: {}]   ;;  %s3249_s1 = inlined_call_operand.hbm [shape: f32[3,96,96], index: 1, kind: input, shape index: {}]   ;;  %s3250_s2 = inlined_call_operand.vmem [shape: f32[4,1,1], index: 2, kind: input, shape index: {}]   ;;  %s3251_s3 = inlined_call_operand.hbm [shape: f32[2,4,16,16], index: 3, kind: output, shape index: {}]  }
   0x1   :  { %10 = vsyncpa [#allocation4 + $0x1], 0 }
   0x2   :  { %11 = vsyncpa [#allocation7], 0 }
   0x3   :  { %12 = vsyncpa [#allocation5], 0 }
   0x4   :  { %14 = vsyncpa [#allocation5 + $0x1], 0  ;;  %s2505_s12 = smov 0   ;;  %s2507_s13 = smov 0  }
   0x5   :  { %s2509_s14 = smov 0   ;;  %s2511_s15 = smov 0  }
   0x6 LB: > { %s2526_s16 = sadd.s32 4294967295, %s2470_s15   ;;  %s1833_s17 = sadd.s32 4294967294, %s2470_s15   ;;  %s2470_s15 = sphi %s2511_s15, %s3271_s15   ;;  %s2466_s14 = sphi %s2509_s14, %s3270_s14   ;;  %s2462_s13 = sphi %s2507_s13, %s3269_s13   ;;  %s2458_s12 = sphi %s2505_s12, %s3268_s12  }
   0x7   : > { %p40_p0 = scmp.ne.s32.totalorder %s2462_s13, %s2458_s12  ;;  %p3252_p1 = scmp.eq.s32.totalorder %s2526_s16, 0 }
   0x8   : > { %p112_p3 = scmp.eq.s32.totalorder %s1833_s17, 1  ;;  %p1834_p5 = scmp.ge.s32.totalorder %s2470_s15, 1 }
   0x9   : > { %p2535_p4 = por %p3252_p1, %p40_p0  ;;  %p119_p7 = scmp.lt.s32.totalorder %s2470_s15, 3 }
   0xa   : > { %p2540_p6 = por %p112_p3, %p40_p0  ;;  %s2472_s21 = smov [#allocation6]  }
   0xb   : > { %s3255_s18 = scalar_select %p2535_p4, 1, 0 }
   0xc   : > { %s3256_s19 = scalar_select %p2540_p6, 1, 0 }
   0xd   : > { %p2545_p8 = pnand %p1834_p5, %p119_p7  ;;  %s131_s22 = sshll.u32 %s2472_s21, 4  ;;  %s2549_s22 = int_to_ptr.vmem [resolvable:$true] %s131_s22 }
   0xe   : > { %s2561_s24 = sadd.s32 1, %s2470_s15   ;;  %s27_s25 = sadd.s32 1, %s2466_s14 }
   0xf   : > { %s3257_s20 = scalar_select %p2545_p8, 1, 0 }
  0x10   : > { %p2205_p9 = pneg %p2545_p8  ;;  %s24_s26 = ssub.s32 %s2470_s15, %s2561_s24 }
  0x11   : > { %s2342_s29 = scalar_lea.hbm %s3249_s1, 4608 }
  0x12   : > { %p2556_p11 = pnand %p2205_p9, %p3252_p1  ;;  %p2343_p12 = scmp.ne.s32.totalorder %s3249_s1, %s2342_s29 }
  0x13   : > { %p2349_p5 = scmp.lt.u32.totalorder %s2342_s29, %s3249_s1 }
  0x14   : > { %p2344_p13 = pneg %p2556_p11 }
  0x16   : > { %p2345_p0 = pnand %p2344_p13, %p2343_p12 }
  0x18   : > { %p2346_p3 = pneg %p2345_p0 }
  0x1a   : > { %p2351_p7 = pnand %p2349_p5, %p2346_p3 }
  0x1c   : > { %2354 = shalt.err (!%p2351_p7)
}
  0x1d   : > { %s2355_s7 = scalar_lea.vmem %s2549_s22, 4608  ;;  %p2363_p2 = scmp.lt.s32.totalorder %s2549_s22, %s2549_s22 }
  0x1e   : > { %p2356_p9 = scmp.ne.s32.totalorder %s2549_s22, %s2355_s7  ;;  %p2364_p6 = scmp.lt.s32.totalorder %s2355_s7, %s2355_s7 }
  0x20   : > { %p2358_p10 = pnand %p2356_p9, %p2344_p13  ;;  %p2365_p4 = por %p2364_p6, %p2363_p2 }
  0x22   : > { %p2359_p1 = pneg %p2358_p10 }
  0x24   : > { %p2366_p8 = pnand %p2365_p4, %p2359_p1 }
  0x26   : > { %2369 = shalt.err (!%p2366_p8)
}
  0x27   : > { %s2473_s8 = smov 128   ;;  %s2474_s9 = smov 8  }
  0x28   : > { %2208 = dma.hbm_to_vmem [thread:$0]  (!%p2556_p11), %s3249_s1, 4608, %s2549_s22, [#allocation7], %s2473_s8, %s2473_s8, %s2474_s9  }
  0x29   : > { %p25_p1 = scmp.eq.s32.totalorder %s24_s26, 0  ;;  %p34_p2 = scmp.ne.s32.totalorder %s2466_s14, %s2462_s13 }
  0x2a   : > { %p35_p4 = scmp.eq.s32.totalorder %s2470_s15, 0  ;;  %p2218_p6 = scmp.lt.s32.totalorder %s2470_s15, 2 }
  0x2b   : > { %s2595_s17 = scalar_select %p25_p1, %s2466_s14, %s27_s25  }
  0x2c   : > { %p36_p8 = por %p35_p4, %p34_p2  ;;  %p3259_p10 = scmp.eq.s32.totalorder %s2526_s16, 1 }
  0x2d   : > { %s148_s23 = sand.u32 1, %s2466_s14   ;;  %s1889_s27 = sshll.u32 %s2470_s15, 10 }
  0x2e   : > { %p2599_p12 = por %p3259_p10, %p34_p2  ;;  %s1837_s28 = sshll.u32 %s148_s23, 6 }
  0x2f   : > { %s2608_s4 = scalar_lea.hbm %s3248_s0, %s1889_s27  ;;  %s152_s22 = scalar_lea.vmem [#allocation3], %s1837_s28 }
  0x30   : > { %s159_s25 = sshll.u32 %s152_s22, 4  ;;  %p2610_p11 = pnand %p2218_p6, %p36_p8  ;;  %s2614_s25 = int_to_ptr.vmem [resolvable:$true] %s159_s25 }
  0x31   : > { %s2616_s5 = scalar_lea.sflag [#allocation4], %s148_s23  ;;  %s2370_s6 = scalar_lea.hbm %s2608_s4, 1024 }
  0x32   : > { %p2371_p13 = scmp.ne.s32.totalorder %s2608_s4, %s2370_s6  ;;  %p2372_p0 = pneg %p2610_p11 }
  0x33   : > { %s2375_s11 = scalar_lea.hbm %s3248_s0, 2048  ;;  %p2376_p7 = scmp.lt.u32.totalorder %s2608_s4, %s3248_s0 }
  0x34   : > { %p2373_p3 = pnand %p2372_p0, %p2371_p13  ;;  %p2377_p9 = scmp.lt.u32.totalorder %s2375_s11, %s2370_s6 }
  0x35   : > { %p2379_p2 = scmp.lt.u32.totalorder %s2370_s6, %s2608_s4 }
  0x36   : > { %p2374_p5 = pneg %p2373_p3  ;;  %p2378_p1 = por %p2377_p9, %p2376_p7 }
  0x38   : > { %p2380_p4 = por %p2379_p2, %p2378_p1 }
  0x3a   : > { %p2381_p6 = pnand %p2380_p4, %p2374_p5 }
  0x3c   : > { %2384 = shalt.err (!%p2381_p6)
}
  0x3d   : > { %s2385_s23 = scalar_lea.vmem %s2614_s25, 1024  ;;  %s2475_s29 = smov [#allocation3]  }
  0x3e   : > { %p2386_p8 = scmp.ne.s32.totalorder %s2614_s25, %s2385_s23  ;;  %s2390_s30 = sshll.u32 %s2475_s29, 4  ;;  %s2391_s30 = int_to_ptr.vmem [resolvable:$false] %s2390_s30 }
  0x3f   : > { %s2392_s22 = scalar_lea.vmem %s2391_s30, 2048  ;;  %p2393_p3 = scmp.lt.s32.totalorder %s2614_s25, %s2391_s30 }
  0x40   : > { %p2388_p10 = pnand %p2386_p8, %p2372_p0  ;;  %p2394_p7 = scmp.lt.s32.totalorder %s2392_s22, %s2385_s23 }
  0x42   : > { %p2389_p13 = pneg %p2388_p10  ;;  %p2395_p9 = por %p2394_p7, %p2393_p3 }
  0x44   : > { %p2396_p1 = pnand %p2395_p9, %p2389_p13 }
  0x46   : > { %2399 = shalt.err (!%p2396_p1)
}
  0x47   : > { %2212 = dma.hbm_to_vmem [thread:$0]  (!%p2610_p11), %s2608_s4, 1024, %s2614_s25, %s2616_s5, %s2473_s8, %s2473_s8, %s2474_s9  }
  0x48   : > { %p3262_p0 = scmp.ne.s32.totalorder %s3257_s20, 0 }
  0x49   : > { %s2650_s6 = sand.u32 (!%p3262_p0), 1, %s2462_s13   ;;  %p3263_p5 = scmp.ne.s32.totalorder (!%p3262_p0), %s3255_s18, 0 }
  0x4a   : > { %171 = sbr.rel (%p3262_p0) target bundleno = 1707 (0x6ab), region = 32  ;;  %s1841_s7 = sshll.u32 (!%p3262_p0), %s2650_s6, 6 }
  0x4b   : > { %s174_s10 = scalar_lea.sflag (!%p3262_p0), [#allocation4], %s2650_s6  ;;  %s2656_s26 = scalar_lea.vmem (!%p3262_p0), [#allocation3], %s1841_s7 }
  0x51   : > { %2445 = dma.done.wait (%p3263_p5), %s174_s10, 1024  }
  0x52   : > { %2447 = vsyncadd (%p3263_p5), %s174_s10, 4294966272  ;;  %p3264_p11 = scmp.eq.s32.totalorder %s2526_s16, 0 }
  0x54   : > { %2449 = dma.done.wait (%p3264_p11), [#allocation7], 4608   ;;  %p3265_p2 = pmov %p3264_p11 }
  0x55   : > { %vm212_vm0 = vcmask 162816   ;;  %v2476_v0 = vmov 0.0   ;;  %vm225_vm1 = vcmask 9216   ;;  %vm268_vm2 = vcmask 15360   ;;  %v2667_v1 = vld [vmem:[%s2656_s26] sm:$0xff]  ;;  %v2670_v2 = vld [vmem:[%s2656_s26 + $0x8] sm:$0xff] }
  0x56   : > { %2451 = vsyncadd (%p3265_p2), [#allocation7], 4294962688  ;;  %213 = vst.msk [vmem:[#allocation2] sm:$0xff] %vm212_vm0, %v2476_v0  ;;  %vm323_vm3 = vcmask 15366   ;;  %v2673_v3 = vld [vmem:[%s2656_s26 + $0x18] sm:$0xff]  ;;  %s2477_s18 = smov 4  }
  0x57   : > { %214 = vst.msk [vmem:[#allocation2 + $0x8] sm:$0xff] %vm212_vm0, %v2476_v0  ;;  %215 = vst.msk [vmem:[#allocation2 + $0x10] sm:$0xff] %vm212_vm0, %v2476_v0  ;;  %251 = vrot.lane.b32.xlu1 %v2667_v1, %s2477_s18  ;;  %s2478_s20 = smov 2   ;;  %v2680_v4 = vld [vmem:[%s2656_s26 + $0x10] sm:$0xff]  ;;  %v2683_v5 = vld [vmem:[%s2656_s26 + $0x28] sm:$0xff]  ;;  %vm246_vm4 = vcmask 140304  }
  0x58   : > { %216 = vst.msk [vmem:[#allocation2 + $0x18] sm:$0xff] %vm212_vm0, %v2476_v0  ;;  %217 = vst.msk [vmem:[#allocation2 + $0x20] sm:$0xff] %vm212_vm0, %v2476_v0  ;;  %234 = vrot.lane.b32.xlu0 %v2667_v1, %s2478_s20  ;;  %v2698_v6 = vld [vmem:[%s2656_s26 + $0x20] sm:$0xff]  ;;  %v2701_v7 = vld [vmem:[%s2656_s26 + $0x38] sm:$0xff]  ;;  %vm293_vm5 = vcmask 146448   ;;  %vm263_vm6 = vcmask 156816  }
  0x59   : > { %218 = vst.msk [vmem:[#allocation2 + $0x28] sm:$0xff] %vm212_vm0, %v2476_v0  ;;  %219 = vst.msk [vmem:[#allocation2 + $0x30] sm:$0xff] %vm212_vm0, %v2476_v0  ;;  %v2704_v8 = vld [vmem:[%s2656_s26 + $0x30] sm:$0xff]  ;;  %vm314_vm7 = vcmask 162960   ;;  %vm328_vm8 = vcmask 146454   ;;  %vm333_vm9 = vcmask 162966  }
  0x5a   : > { %220 = vst.msk [vmem:[#allocation2 + $0x38] sm:$0xff] %vm212_vm0, %v2476_v0  ;;  %221 = vst.msk [vmem:[#allocation2 + $0x40] sm:$0xff] %vm212_vm0, %v2476_v0  ;;  %s2479_s8 = smov 127   ;;  %vm398_vm10 = vcmask 146433   ;;  %vm402_vm11 = vcmask 146432   ;;  %vm406_vm12 = vcmask 141312  }
  0x5b   : > { %222 = vst.msk [vmem:[#allocation2 + $0x48] sm:$0xff] %vm212_vm0, %v2476_v0  ;;  %223 = vst.msk [vmem:[#allocation2 + $0x50] sm:$0xff] %vm212_vm0, %v2476_v0  ;;  %302 = vrot.lane.b32.xlu1 %v2670_v2, %s2477_s18  ;;  %vm462_vm13 = vcmask 1046528   ;;  %vm496_vm14 = vcmask 1041408   ;;  %vm845_vm15 = vcmask 785408   ;;  %s2480_s9 = smov 126  }
  0x5c   : > { %224 = vst.msk [vmem:[#allocation2 + $0x58] sm:$0xff] %vm212_vm0, %v2476_v0  ;;  %281 = vrot.lane.b32.xlu0 %v2670_v2, %s2478_s20  ;;  %vm1448_vm0 = vcmask 140288   ;;  %s203_s30 = scalar_lea.vmem [#allocation8], %s1841_s7  ;;  %s1890_s22 = sshll.u32 %s2526_s16, 10 }
  0x5d   : > { %226 = vst.msk [vmem:[#allocation2] sm:$0x3] %vm225_vm1, %v2667_v1  ;;  %227 = vst.msk [vmem:[#allocation2 + $0x18] sm:$0x3] %vm225_vm1, %v2680_v4  ;;  %s1750_s7 = sshll.u32 %s203_s30, 4  ;;  %s1737_s16 = scalar_lea.sflag [#allocation5], %s2650_s6  ;;  %s3200_s7 = int_to_ptr.vmem [resolvable:$true] %s1750_s7 }
  0x5e   : > { %269 = vst.msk [vmem:[#allocation2 + $0x2] sm:$0xff] %vm268_vm2, %v2667_v1  ;;  %270 = vst.msk [vmem:[#allocation2 + $0xa] sm:$0xff] %vm268_vm2, %v2670_v2 }
  0x5f   : > { %272 = vst.msk [vmem:[#allocation2 + $0x22] sm:$0xff] %vm268_vm2, %v2673_v3  ;;  %271 = vst.msk [vmem:[#allocation2 + $0x1a] sm:$0xff] %vm268_vm2, %v2680_v4  ;;  %283 = vrot.lane.b32.xlu1 %v2673_v3, %s2478_s20 }
  0x60   : > { %324 = vst.msk [vmem:[#allocation2 + $0xc] sm:$0xc0] %vm323_vm3, %v2670_v2  ;;  %325 = vst.msk [vmem:[#allocation2 + $0x24] sm:$0xc0] %vm323_vm3, %v2673_v3  ;;  %236 = vrot.lane.b32.xlu0 %v2680_v4, %s2478_s20 }
  0x61   : > { %274 = vst.msk [vmem:[#allocation2 + $0x3a] sm:$0xff] %vm268_vm2, %v2683_v5  ;;  %273 = vst.msk [vmem:[#allocation2 + $0x32] sm:$0xff] %vm268_vm2, %v2698_v6 }
  0x62   : > { %326 = vst.msk [vmem:[#allocation2 + $0x3c] sm:$0xc0] %vm323_vm3, %v2683_v5  ;;  %327 = vst.msk [vmem:[#allocation2 + $0x54] sm:$0xc0] %vm323_vm3, %v2701_v7 }
  0x63   : > { %228 = vst.msk [vmem:[#allocation2 + $0x30] sm:$0x3] %vm225_vm1, %v2698_v6  ;;  %229 = vst.msk [vmem:[#allocation2 + $0x48] sm:$0x3] %vm225_vm1, %v2704_v8  ;;  %304 = vrot.lane.b32.xlu1 %v2673_v3, %s2477_s18  ;;  %vm1727_vm1 = vcmask 130048  }
  0x64   : > { %275 = vst.msk [vmem:[#allocation2 + $0x4a] sm:$0xff] %vm268_vm2, %v2704_v8  ;;  %276 = vst.msk [vmem:[#allocation2 + $0x52] sm:$0xff] %vm268_vm2, %v2701_v7  ;;  %253 = vrot.lane.b32.xlu0 %v2680_v4, %s2477_s18 }
  0x67   : > { %285 = vrot.lane.b32.xlu1 %v2683_v5, %s2478_s20 }
  0x68   : > { %238 = vrot.lane.b32.xlu0 %v2698_v6, %s2478_s20 }
  0x6b   : > { %306 = vrot.lane.b32.xlu1 %v2683_v5, %s2477_s18 }
  0x6c   : > { %255 = vrot.lane.b32.xlu0 %v2698_v6, %s2477_s18 }
  0x6f   : > { %287 = vrot.lane.b32.xlu1 %v2701_v7, %s2478_s20 }
  0x70   : > { %240 = vrot.lane.b32.xlu0 %v2704_v8, %s2478_s20  ;;  %s2400_s20 = scalar_lea.vmem %s3200_s7, 1024 }
  0x71   : > { %p2401_p4 = scmp.ne.s32.totalorder %s3200_s7, %s2400_s20 }
  0x73   : > { %308 = vrot.lane.b32.xlu1 %v2701_v7, %s2477_s18  ;;  %p2402_p6 = pnand %p2401_p4, %p2599_p12 }
  0x74   : > { %257 = vrot.lane.b32.xlu0 %v2704_v8, %s2477_s18  ;;  %s3198_s18 = scalar_lea.hbm %s3251_s3, %s1890_s22 }
  0x75   : > { %p2403_p8 = pneg %p2402_p6 }
  0xc9   : > { %v252_v9 = vpop.permute.xlu1 %251 }
  0xca   : > { %v235_v10 = vpop.permute.xlu0 %234 }
  0xcb   : > { %247 = vst.msk [vmem:[#allocation2] sm:$0x3] %vm246_vm4, %v235_v10 }
  0xcc   : > { %294 = vst.msk [vmem:[#allocation2 + $0x2] sm:$0xff] %vm293_vm5, %v235_v10 }
  0xcd   : > { %264 = vst.msk [vmem:[#allocation2] sm:$0x3] %vm263_vm6, %v252_v9  ;;  %v303_v11 = vpop.permute.xlu1 %302 }
  0xce   : > { %315 = vst.msk [vmem:[#allocation2 + $0x2] sm:$0xff] %vm314_vm7, %v252_v9  ;;  %v282_v12 = vpop.permute.xlu0 %281 }
  0xcf   : > { %295 = vst.msk [vmem:[#allocation2 + $0xa] sm:$0xff] %vm293_vm5, %v282_v12 }
  0xd0   : > { %329 = vst.msk [vmem:[#allocation2 + $0xc] sm:$0xc0] %vm328_vm8, %v282_v12 }
  0xd1   : > { %316 = vst.msk [vmem:[#allocation2 + $0xa] sm:$0xff] %vm314_vm7, %v303_v11  ;;  %v284_v13 = vpop.permute.xlu1 %283 }
  0xd2   : > { %334 = vst.msk [vmem:[#allocation2 + $0xc] sm:$0xc0] %vm333_vm9, %v303_v11  ;;  %v237_v14 = vpop.permute.xlu0 %236 }
  0xd3   : > { %297 = vst.msk [vmem:[#allocation2 + $0x22] sm:$0xff] %vm293_vm5, %v284_v13  ;;  %296 = vst.msk [vmem:[#allocation2 + $0x1a] sm:$0xff] %vm293_vm5, %v237_v14 }
  0xd4   : > { %330 = vst.msk [vmem:[#allocation2 + $0x24] sm:$0xc0] %vm328_vm8, %v284_v13 }
  0xd5   : > { %248 = vst.msk [vmem:[#allocation2 + $0x18] sm:$0x3] %vm246_vm4, %v237_v14  ;;  %v2766_v15 = vld [vmem:[#allocation2] sm:$0xff]  ;;  %v305_v16 = vpop.permute.xlu1 %304 }
  0xd6   : > { %362 = vrot.lane.b32.xlu0 %v2766_v15, %s2479_s8  ;;  %v254_v17 = vpop.permute.xlu0 %253  ;;  %318 = vst.msk [vmem:[#allocation2 + $0x22] sm:$0xff] %vm314_vm7, %v305_v16 }
  0xd7   : > { %335 = vst.msk [vmem:[#allocation2 + $0x24] sm:$0xc0] %vm333_vm9, %v305_v16 }
  0xd8   : > { %265 = vst.msk [vmem:[#allocation2 + $0x18] sm:$0x3] %vm263_vm6, %v254_v17  ;;  %v2774_v18 = vld [vmem:[#allocation2 + $0x8] sm:$0xff] }
  0xd9   : > { %317 = vst.msk [vmem:[#allocation2 + $0x1a] sm:$0xff] %vm314_vm7, %v254_v17  ;;  %v2776_v19 = vld [vmem:[#allocation2 + $0x10] sm:$0xff]  ;;  %364 = vrot.lane.b32.xlu1 %v2774_v18, %s2479_s8  ;;  %v286_v20 = vpop.permute.xlu1 %285 }
  0xda   : > { %366 = vrot.lane.b32.xlu0 %v2776_v19, %s2479_s8  ;;  %v239_v21 = vpop.permute.xlu0 %238  ;;  %299 = vst.msk [vmem:[#allocation2 + $0x3a] sm:$0xff] %vm293_vm5, %v286_v20 }
  0xdb   : > { %331 = vst.msk [vmem:[#allocation2 + $0x3c] sm:$0xc0] %vm328_vm8, %v286_v20 }
  0xdc   : > { %249 = vst.msk [vmem:[#allocation2 + $0x30] sm:$0x3] %vm246_vm4, %v239_v21 }
  0xdd   : > { %298 = vst.msk [vmem:[#allocation2 + $0x32] sm:$0xff] %vm293_vm5, %v239_v21  ;;  %v307_v22 = vpop.permute.xlu1 %306 }
  0xde   : > { %v256_v23 = vpop.permute.xlu0 %255  ;;  %320 = vst.msk [vmem:[#allocation2 + $0x3a] sm:$0xff] %vm314_vm7, %v307_v22  ;;  %v2798_v26 = vld [vmem:[#allocation2 + $0x28] sm:$0xff] }
  0xdf   : > { %336 = vst.msk [vmem:[#allocation2 + $0x3c] sm:$0xc0] %vm333_vm9, %v307_v22 }
  0xe0   : > { %v2786_v24 = vld [vmem:[#allocation2 + $0x18] sm:$0xff]  ;;  %v2788_v25 = vld [vmem:[#allocation2 + $0x20] sm:$0xff]  ;;  %266 = vst.msk [vmem:[#allocation2 + $0x30] sm:$0x3] %vm263_vm6, %v256_v23 }
  0xe1   : > { %319 = vst.msk [vmem:[#allocation2 + $0x32] sm:$0xff] %vm314_vm7, %v256_v23  ;;  %368 = vrot.lane.b32.xlu1 %v2786_v24, %s2479_s8  ;;  %370 = vrot.lane.b32.xlu0 %v2788_v25, %s2479_s8  ;;  %v288_v27 = vpop.permute.xlu1 %287 }
  0xe2   : > { %v241_v28 = vpop.permute.xlu0 %240  ;;  %301 = vst.msk [vmem:[#allocation2 + $0x52] sm:$0xff] %vm293_vm5, %v288_v27 }
  0xe3   : > { %332 = vst.msk [vmem:[#allocation2 + $0x54] sm:$0xc0] %vm328_vm8, %v288_v27 }
  0xe4   : > { %250 = vst.msk [vmem:[#allocation2 + $0x48] sm:$0x3] %vm246_vm4, %v241_v28 }
  0xe5   : > { %300 = vst.msk [vmem:[#allocation2 + $0x4a] sm:$0xff] %vm293_vm5, %v241_v28  ;;  %372 = vrot.lane.b32.xlu1 %v2798_v26, %s2479_s8  ;;  %v309_v29 = vpop.permute.xlu1 %308 }
  0xe6   : > { %v258_v30 = vpop.permute.xlu0 %257  ;;  %322 = vst.msk [vmem:[#allocation2 + $0x52] sm:$0xff] %vm314_vm7, %v309_v29  ;;  %v2818_v33 = vld [vmem:[#allocation2 + $0x40] sm:$0xff] }
  0xe7   : > { %337 = vst.msk [vmem:[#allocation2 + $0x54] sm:$0xc0] %vm333_vm9, %v309_v29 }
  0xe8   : > { %v2806_v31 = vld [vmem:[#allocation2 + $0x38] sm:$0xff]  ;;  %v2808_v32 = vld [vmem:[#allocation2 + $0x30] sm:$0xff]  ;;  %267 = vst.msk [vmem:[#allocation2 + $0x48] sm:$0x3] %vm263_vm6, %v258_v30 }
  0xe9   : > { %321 = vst.msk [vmem:[#allocation2 + $0x4a] sm:$0xff] %vm314_vm7, %v258_v30  ;;  %376 = vrot.lane.b32.xlu1 %v2806_v31, %s2479_s8  ;;  %374 = vrot.lane.b32.xlu0 %v2808_v32, %s2479_s8 }
  0xed   : > { %378 = vrot.lane.b32.xlu0 %v2818_v33, %s2479_s8 }
  0xee   : > { %v2830_v36 = vld [vmem:[#allocation2 + $0x58] sm:$0xff] }
  0xf0   : > { %v2822_v34 = vld [vmem:[#allocation2 + $0x48] sm:$0xff]  ;;  %v2824_v35 = vld [vmem:[#allocation2 + $0x50] sm:$0xff] }
  0xf1   : > { %380 = vrot.lane.b32.xlu1 %v2822_v34, %s2479_s8  ;;  %382 = vrot.lane.b32.xlu0 %v2824_v35, %s2479_s8 }
  0xf5   : > { %384 = vrot.lane.b32.xlu1 %v2830_v36, %s2479_s8 }
 0x148   : > { %v363_v37 = vpop.permute.xlu0 %362 }
 0x149   : > { %v399_v38 = vsel %vm398_vm10, %v363_v37, 0.0 }
 0x14a   : > { %400 = vadd.xlane.f32.xlu0 %v399_v38 }
 0x14b   : > { %v365_v39 = vpop.permute.xlu1 %364 }
 0x14c   : > { %v367_v40 = vpop.permute.xlu0 %366  ;;  %v403_v41 = vsel %vm402_vm11, %v365_v39, 0.0 }
 0x14d   : > { %v407_v42 = vsel %vm406_vm12, %v367_v40, 0.0  ;;  %404 = vadd.xlane.f32.xlu1 %v403_v41 }
 0x14e   : > { %408 = vadd.xlane.f32.xlu0 %v407_v42 }
 0x153   : > { %v369_v43 = vpop.permute.xlu1 %368  ;;  %v371_v44 = vpop.permute.xlu0 %370 }
 0x154   : > { %v410_v45 = vsel %vm398_vm10, %v369_v43, 0.0  ;;  %v413_v46 = vsel %vm402_vm11, %v371_v44, 0.0 }
 0x155   : > { %411 = vadd.xlane.f32.xlu0 %v410_v45  ;;  %414 = vadd.xlane.f32.xlu1 %v413_v46 }
 0x157   : > { %v373_v47 = vpop.permute.xlu1 %372 }
 0x158   : > { %v416_v48 = vsel %vm406_vm12, %v373_v47, 0.0 }
 0x159   : > { %417 = vadd.xlane.f32.xlu0 %v416_v48 }
 0x15b   : > { %v377_v49 = vpop.permute.xlu1 %376  ;;  %v375_v50 = vpop.permute.xlu0 %374 }
 0x15c   : > { %v422_v51 = vsel %vm402_vm11, %v377_v49, 0.0  ;;  %v419_v52 = vsel %vm398_vm10, %v375_v50, 0.0 }
 0x15d   : > { %423 = vadd.xlane.f32.xlu0 %v422_v51  ;;  %420 = vadd.xlane.f32.xlu1 %v419_v52 }
 0x15f   : > { %v379_v53 = vpop.permute.xlu0 %378 }
 0x160   : > { %v425_v54 = vsel %vm406_vm12, %v379_v53, 0.0 }
 0x161   : > { %426 = vadd.xlane.f32.xlu1 %v425_v54 }
 0x163   : > { %v381_v55 = vpop.permute.xlu1 %380  ;;  %v383_v56 = vpop.permute.xlu0 %382 }
 0x164   : > { %v428_v57 = vsel %vm398_vm10, %v381_v55, 0.0  ;;  %v431_v58 = vsel %vm402_vm11, %v383_v56, 0.0 }
 0x165   : > { %429 = vadd.xlane.f32.xlu0 %v428_v57  ;;  %432 = vadd.xlane.f32.xlu1 %v431_v58 }
 0x167   : > { %v385_v59 = vpop.permute.xlu1 %384 }
 0x168   : > { %v434_v60 = vsel %vm406_vm12, %v385_v59, 0.0 }
 0x169   : > { %435 = vadd.xlane.f32.xlu0 %v434_v60 }
 0x1d7   : > { %v401_v61 = vpop.xlane.xlu0 %400 }
 0x1d8   : > { %v438_v62 = vmul.f32 0.055555556, %v401_v61 }
 0x1da   : > { %v405_v63 = vpop.xlane.xlu1 %404  ;;  %v463_v9 = vrot.slane %v438_v62, 1 }
 0x1db   : > { %v409_v0 = vpop.xlane.xlu0 %408  ;;  %v439_v10 = vmul.f32 0.055555556, %v405_v63 }
 0x1dc   : > { %v440_v11 = vmul.f32 0.055555556, %v409_v0 }
 0x1dd   : > { %v464_v12 = vrot.slane %v439_v10, 1 }
 0x1de   : > { %v466_v13 = vrot.slane %v440_v11, 1 }
 0x1df   : > { %v465_v14 = vsel %vm462_vm13, %v463_v9, %v464_v12 }
 0x1e0   : > { %v467_v16 = vsel %vm462_vm13, %v464_v12, %v466_v13  ;;  %v497_v17 = vsel %vm496_vm14, %v466_v13, 0.0 }
 0x1e1   : > { %v495_v20 = vadd.f32 %v467_v16, %v465_v14 }
 0x1e2   : > { %v415_v21 = vpop.xlane.xlu1 %414  ;;  %v412_v22 = vpop.xlane.xlu0 %411 }
 0x1e3   : > { %v498_v23 = vadd.f32 %v497_v17, %v495_v20  ;;  %v442_v27 = vmul.f32 0.055555556, %v415_v21  ;;  %v441_v28 = vmul.f32 0.055555556, %v412_v22 }
 0x1e5   : > { %v499_v29 = vrot.slane %v498_v23, 4  ;;  %v469_v38 = vrot.slane %v442_v27, 1  ;;  %v468_v39 = vrot.slane %v441_v28, 1 }
 0x1e6   : > { %v418_v30 = vpop.xlane.xlu0 %417 }
 0x1e7   : > { %v500_v37 = vadd.f32 %v499_v29, %v498_v23  ;;  %v443_v40 = vmul.f32 0.055555556, %v418_v30  ;;  %v470_v46 = vsel %vm462_vm13, %v468_v39, %v469_v38 }
 0x1e9   : > { %v501_v41 = vrot.slane %v500_v37, 2  ;;  %v471_v42 = vrot.slane %v443_v40, 1 }
 0x1ea   : > { %v421_v43 = vpop.xlane.xlu1 %420  ;;  %v424_v44 = vpop.xlane.xlu0 %423 }
 0x1eb   : > { %v502_v45 = vadd.f32 %v501_v41, %v500_v37  ;;  %v472_v47 = vsel %vm462_vm13, %v469_v38, %v471_v42  ;;  %v444_v48 = vmul.f32 0.055555556, %v421_v43  ;;  %v445_v50 = vmul.f32 0.055555556, %v424_v44 }
 0x1ec   : > { %v505_v49 = vadd.f32 %v472_v47, %v470_v46  ;;  %v506_v52 = vsel %vm496_vm14, %v471_v42, 0.0 }
 0x1ed   : > { %v503_v51 = vrot.slane %v502_v45, 1  ;;  %v473_v56 = vrot.slane %v444_v48, 1  ;;  %v474_v57 = vrot.slane %v445_v50, 1 }
 0x1ee   : > { %v507_v53 = vadd.f32 %v506_v52, %v505_v49  ;;  %v427_v54 = vpop.xlane.xlu1 %426 }
 0x1ef   : > { %v504_v55 = vadd.f32 %v503_v51, %v502_v45  ;;  %v446_v58 = vmul.f32 0.055555556, %v427_v54  ;;  %v475_v9 = vsel %vm462_vm13, %v473_v56, %v474_v57 }
 0x1f0   : > { %v508_v59 = vrot.slane %v507_v53, 4 }
 0x1f1   : > { %v476_v60 = vrot.slane %v446_v58, 1  ;;  %v532_v61 = vmul.f32 0.055555556, %v504_v55 }
 0x1f2   : > { %v509_v62 = vadd.f32 %v508_v59, %v507_v53  ;;  %v433_v63 = vpop.xlane.xlu1 %432  ;;  %v430_v0 = vpop.xlane.xlu0 %429 }
 0x1f3   : > { %v477_v10 = vsel %vm462_vm13, %v474_v57, %v476_v60  ;;  %v448_v11 = vmul.f32 0.055555556, %v433_v63  ;;  %v447_v12 = vmul.f32 0.055555556, %v430_v0  ;;  %v2855_v16 = vsub.f32 %v2774_v18, %v532_v61 }
 0x1f4   : > { %v510_v13 = vrot.slane %v509_v62, 2  ;;  %v514_v14 = vadd.f32 %v477_v10, %v475_v9  ;;  %v2858_v17 = vsub.f32 %v2766_v15, %v532_v61  ;;  %v515_v20 = vsel %vm496_vm14, %v476_v60, 0.0 }
 0x1f5   : > { %v2862_v21 = vsub.f32 %v2776_v19, %v532_v61  ;;  %v549_v28 = vmul.f32 %v2855_v16, %v2855_v16  ;;  %v479_v30 = vrot.slane %v448_v11, 1  ;;  %v478_v18 = vrot.slane %v447_v12, 1 }
 0x1f6   : > { %v511_v22 = vadd.f32 %v510_v13, %v509_v62  ;;  %v516_v23 = vadd.f32 %v515_v20, %v514_v14  ;;  %v436_v27 = vpop.xlane.xlu0 %435  ;;  %v548_v29 = vmul.f32 %v2858_v17, %v2858_v17 }
 0x1f7   : > { %v449_v37 = vmul.f32 0.055555556, %v436_v27  ;;  %574 = vrot.lane.b32.xlu0 %v549_v28, %s2479_s8  ;;  %v550_v41 = vmul.f32 %v2862_v21, %v2862_v21  ;;  %v480_v42 = vsel %vm462_vm13, %v478_v18, %v479_v30 }
 0x1f8   : > { %v512_v38 = vrot.slane %v511_v22, 1  ;;  %v517_v15 = vrot.slane %v516_v23, 4  ;;  %572 = vrot.lane.b32.xlu1 %v548_v29, %s2479_s8 }
 0x1f9   : > { %v481_v19 = vrot.slane %v449_v37, 1 }
 0x1fa   : > { %v513_v39 = vadd.f32 %v512_v38, %v511_v22  ;;  %v518_v40 = vadd.f32 %v517_v15, %v516_v23 }
 0x1fb   : > { %v482_v43 = vsel %vm462_vm13, %v479_v30, %v481_v19  ;;  %v524_v47 = vsel %vm496_vm14, %v481_v19, 0.0 }
 0x1fc   : > { %v519_v44 = vrot.slane %v518_v40, 2  ;;  %v523_v45 = vadd.f32 %v482_v43, %v480_v42  ;;  %576 = vrot.lane.b32.xlu1 %v550_v41, %s2479_s8  ;;  %v533_v46 = vmul.f32 0.055555556, %v513_v39 }
 0x1fe   : > { %v520_v48 = vadd.f32 %v519_v44, %v518_v40  ;;  %v525_v49 = vadd.f32 %v524_v47, %v523_v45  ;;  %v2877_v50 = vsub.f32 %v2788_v25, %v533_v46  ;;  %v2880_v51 = vsub.f32 %v2786_v24, %v533_v46 }
 0x1ff   : > { %v2883_v52 = vsub.f32 %v2798_v26, %v533_v46 }
 0x200   : > { %v521_v53 = vrot.slane %v520_v48, 1  ;;  %v526_v54 = vrot.slane %v525_v49, 4  ;;  %v552_v55 = vmul.f32 %v2877_v50, %v2877_v50  ;;  %v551_v56 = vmul.f32 %v2880_v51, %v2880_v51 }
 0x201   : > { %v553_v24 = vmul.f32 %v2883_v52, %v2883_v52 }
 0x202   : > { %v522_v57 = vadd.f32 %v521_v53, %v520_v48  ;;  %v527_v58 = vadd.f32 %v526_v54, %v525_v49  ;;  %580 = vrot.lane.b32.xlu0 %v552_v55, %s2479_s8  ;;  %578 = vrot.lane.b32.xlu1 %v551_v56, %s2479_s8 }
 0x204   : > { %v528_v25 = vrot.slane %v527_v58, 2  ;;  %v534_v26 = vmul.f32 0.055555556, %v522_v57 }
 0x206   : > { %v529_v59 = vadd.f32 %v528_v25, %v527_v58  ;;  %582 = vrot.lane.b32.xlu1 %v553_v24, %s2479_s8  ;;  %v2895_v60 = vsub.f32 %v2806_v31, %v534_v26  ;;  %v2898_v61 = vsub.f32 %v2808_v32, %v534_v26  ;;  %v2905_v9 = vsub.f32 %v2818_v33, %v534_v26 }
 0x208   : > { %v530_v62 = vrot.slane %v529_v59, 1  ;;  %v555_v63 = vmul.f32 %v2895_v60, %v2895_v60  ;;  %v554_v0 = vmul.f32 %v2898_v61, %v2898_v61  ;;  %v556_v31 = vmul.f32 %v2905_v9, %v2905_v9 }
 0x20a   : > { %v531_v10 = vadd.f32 %v530_v62, %v529_v59  ;;  %586 = vrot.lane.b32.xlu1 %v555_v63, %s2479_s8  ;;  %584 = vrot.lane.b32.xlu0 %v554_v0, %s2479_s8 }
 0x20c   : > { %v535_v32 = vmul.f32 0.055555556, %v531_v10 }
 0x20e   : > { %588 = vrot.lane.b32.xlu0 %v556_v31, %s2479_s8  ;;  %v2913_v11 = vsub.f32 %v2824_v35, %v535_v32  ;;  %v2916_v12 = vsub.f32 %v2822_v34, %v535_v32  ;;  %v2923_v14 = vsub.f32 %v2830_v36, %v535_v32 }
 0x210   : > { %v558_v33 = vmul.f32 %v2913_v11, %v2913_v11  ;;  %v557_v13 = vmul.f32 %v2916_v12, %v2916_v12  ;;  %v559_v35 = vmul.f32 %v2923_v14, %v2923_v14 }
 0x212   : > { %592 = vrot.lane.b32.xlu0 %v558_v33, %s2479_s8  ;;  %590 = vrot.lane.b32.xlu1 %v557_v13, %s2479_s8 }
 0x216   : > { %594 = vrot.lane.b32.xlu1 %v559_v35, %s2479_s8 }
 0x269   : > { %v575_v20 = vpop.permute.xlu0 %574 }
 0x26a   : > { %v573_v34 = vpop.permute.xlu1 %572  ;;  %v611_v23 = vsel %vm402_vm11, %v575_v20, 0.0 }
 0x26b   : > { %v608_v22 = vsel %vm398_vm10, %v573_v34, 0.0  ;;  %612 = vadd.xlane.f32.xlu1 %v611_v23 }
 0x26c   : > { %609 = vadd.xlane.f32.xlu0 %v608_v22 }
 0x26e   : > { %v577_v27 = vpop.permute.xlu1 %576 }
 0x26f   : > { %v614_v36 = vsel %vm406_vm12, %v577_v27, 0.0 }
 0x270   : > { %615 = vadd.xlane.f32.xlu0 %v614_v36 }
 0x274   : > { %v579_v28 = vpop.permute.xlu1 %578  ;;  %v581_v29 = vpop.permute.xlu0 %580 }
 0x275   : > { %v617_v30 = vsel %vm398_vm10, %v579_v28, 0.0  ;;  %v620_v18 = vsel %vm402_vm11, %v581_v29, 0.0 }
 0x276   : > { %618 = vadd.xlane.f32.xlu0 %v617_v30  ;;  %621 = vadd.xlane.f32.xlu1 %v620_v18 }
 0x278   : > { %v583_v37 = vpop.permute.xlu1 %582 }
 0x279   : > { %v623_v38 = vsel %vm406_vm12, %v583_v37, 0.0 }
 0x27a   : > { %624 = vadd.xlane.f32.xlu0 %v623_v38 }
 0x27c   : > { %v587_v15 = vpop.permute.xlu1 %586  ;;  %v585_v19 = vpop.permute.xlu0 %584 }
 0x27d   : > { %v629_v39 = vsel %vm402_vm11, %v587_v15, 0.0  ;;  %v626_v40 = vsel %vm398_vm10, %v585_v19, 0.0 }
 0x27e   : > { %630 = vadd.xlane.f32.xlu0 %v629_v39  ;;  %627 = vadd.xlane.f32.xlu1 %v626_v40 }
 0x280   : > { %v589_v41 = vpop.permute.xlu0 %588 }
 0x281   : > { %v632_v42 = vsel %vm406_vm12, %v589_v41, 0.0 }
 0x282   : > { %633 = vadd.xlane.f32.xlu1 %v632_v42 }
 0x284   : > { %v591_v43 = vpop.permute.xlu1 %590  ;;  %v593_v44 = vpop.permute.xlu0 %592 }
 0x285   : > { %v635_v45 = vsel %vm398_vm10, %v591_v43, 0.0  ;;  %v638_v46 = vsel %vm402_vm11, %v593_v44, 0.0 }
 0x286   : > { %636 = vadd.xlane.f32.xlu0 %v635_v45  ;;  %639 = vadd.xlane.f32.xlu1 %v638_v46 }
 0x288   : > { %v595_v47 = vpop.permute.xlu1 %594 }
 0x289   : > { %v641_v48 = vsel %vm406_vm12, %v595_v47, 0.0 }
 0x28a   : > { %642 = vadd.xlane.f32.xlu0 %v641_v48 }
 0x2f8   : > { %v613_v49 = vpop.xlane.xlu1 %612 }
 0x2f9   : > { %v610_v53 = vpop.xlane.xlu0 %609  ;;  %v645_v54 = vmul.f32 0.055555556, %v613_v49 }
 0x2fa   : > { %v644_v55 = vmul.f32 0.055555556, %v610_v53 }
 0x2fb   : > { %v669_v57 = vrot.slane %v645_v54, 1 }
 0x2fc   : > { %v668_v58 = vrot.slane %v644_v55, 1 }
 0x2fd   : > { %v616_v56 = vpop.xlane.xlu0 %615 }
 0x2fe   : > { %v646_v25 = vmul.f32 0.055555556, %v616_v56  ;;  %v670_v26 = vsel %vm462_vm13, %v668_v58, %v669_v57 }
 0x300   : > { %v671_v24 = vrot.slane %v646_v25, 1 }
 0x302   : > { %v672_v59 = vsel %vm462_vm13, %v669_v57, %v671_v24  ;;  %v701_v10 = vsel %vm496_vm14, %v671_v24, 0.0 }
 0x303   : > { %v700_v62 = vadd.f32 %v672_v59, %v670_v26  ;;  %v622_v63 = vpop.xlane.xlu1 %621  ;;  %v619_v0 = vpop.xlane.xlu0 %618 }
 0x304   : > { %v648_v31 = vmul.f32 0.055555556, %v622_v63  ;;  %v647_v32 = vmul.f32 0.055555556, %v619_v0 }
 0x305   : > { %v702_v33 = vadd.f32 %v701_v10, %v700_v62 }
 0x306   : > { %v674_v34 = vrot.slane %v648_v31, 1  ;;  %v673_v20 = vrot.slane %v647_v32, 1 }
 0x307   : > { %v703_v13 = vrot.slane %v702_v33, 4  ;;  %v625_v35 = vpop.xlane.xlu0 %624 }
 0x308   : > { %v649_v22 = vmul.f32 0.055555556, %v625_v35  ;;  %v675_v30 = vsel %vm462_vm13, %v673_v20, %v674_v34 }
 0x309   : > { %v704_v23 = vadd.f32 %v703_v13, %v702_v33 }
 0x30a   : > { %v676_v27 = vrot.slane %v649_v22, 1 }
 0x30b   : > { %v705_v36 = vrot.slane %v704_v23, 2  ;;  %v628_v28 = vpop.xlane.xlu1 %627  ;;  %v631_v29 = vpop.xlane.xlu0 %630 }
 0x30c   : > { %v677_v18 = vsel %vm462_vm13, %v674_v34, %v676_v27  ;;  %v650_v37 = vmul.f32 0.055555556, %v628_v28  ;;  %v651_v38 = vmul.f32 0.055555556, %v631_v29  ;;  %v710_v39 = vsel %vm496_vm14, %v676_v27, 0.0 }
 0x30d   : > { %v706_v15 = vadd.f32 %v705_v36, %v704_v23  ;;  %v709_v19 = vadd.f32 %v677_v18, %v675_v30 }
 0x30e   : > { %v678_v43 = vrot.slane %v650_v37, 1  ;;  %v679_v44 = vrot.slane %v651_v38, 1 }
 0x30f   : > { %v707_v40 = vrot.slane %v706_v15, 1  ;;  %v711_v41 = vadd.f32 %v710_v39, %v709_v19  ;;  %v634_v42 = vpop.xlane.xlu1 %633 }
 0x310   : > { %v652_v45 = vmul.f32 0.055555556, %v634_v42  ;;  %v680_v56 = vsel %vm462_vm13, %v678_v43, %v679_v44 }
 0x311   : > { %v708_v46 = vadd.f32 %v707_v40, %v706_v15  ;;  %v712_v47 = vrot.slane %v711_v41, 4 }
 0x312   : > { %v681_v48 = vrot.slane %v652_v45, 1 }
 0x313   : > { %v736_v49 = vmul.f32 0.055555556, %v708_v46  ;;  %v713_v53 = vadd.f32 %v712_v47, %v711_v41  ;;  %v640_v54 = vpop.xlane.xlu1 %639  ;;  %v637_v55 = vpop.xlane.xlu0 %636 }
 0x314   : > { %v682_v57 = vsel %vm462_vm13, %v679_v44, %v681_v48  ;;  %v654_v58 = vmul.f32 0.055555556, %v640_v54  ;;  %v653_v25 = vmul.f32 0.055555556, %v637_v55  ;;  %v719_v62 = vsel %vm496_vm14, %v681_v48, 0.0 }
 0x315   : > { %v740_v24 = vadd.f32 1e-05, %v736_v49  ;;  %v714_v26 = vrot.slane %v713_v53, 2  ;;  %v718_v59 = vadd.f32 %v682_v57, %v680_v56 }
 0x316   : > { %v684_v31 = vrot.slane %v654_v58, 1  ;;  %v683_v32 = vrot.slane %v653_v25, 1 }
 0x317   : > { %2326 = vrsqrt.f32 %v740_v24  ;;  %v715_v63 = vadd.f32 %v714_v26, %v713_v53  ;;  %v720_v0 = vadd.f32 %v719_v62, %v718_v59  ;;  %v643_v10 = vpop.xlane.xlu0 %642 }
 0x318   : > { %v655_v33 = vmul.f32 0.055555556, %v643_v10  ;;  %v685_v23 = vsel %vm462_vm13, %v683_v32, %v684_v31 }
 0x319   : > { %v716_v13 = vrot.slane %v715_v63, 1  ;;  %v721_v35 = vrot.slane %v720_v0, 4 }
 0x31a   : > { %v686_v34 = vrot.slane %v655_v33, 1 }
 0x31b   : > { %v717_v20 = vadd.f32 %v716_v13, %v715_v63  ;;  %v722_v22 = vadd.f32 %v721_v35, %v720_v0 }
 0x31c   : > { %v687_v27 = vsel %vm462_vm13, %v684_v31, %v686_v34  ;;  %v728_v30 = vsel %vm496_vm14, %v686_v34, 0.0 }
 0x31d   : > { %v737_v36 = vmul.f32 0.055555556, %v717_v20  ;;  %v723_v28 = vrot.slane %v722_v22, 2  ;;  %v727_v29 = vadd.f32 %v687_v27, %v685_v23  ;;  %v772_v23 = vld [vmem:[#allocation6] sm:$0xff] }
 0x31e   : > { %2029 = vmatprep.mubr.msk.f32.mxu0 %vm845_vm15, %v772_v23 }
 0x31f   : > { %v741_v18 = vadd.f32 1e-05, %v737_v36  ;;  %v724_v37 = vadd.f32 %v723_v28, %v722_v22  ;;  %v729_v38 = vadd.f32 %v728_v30, %v727_v29 }
 0x321   : > { %v2327_v15 = vpop.eup %2326  ;;  %2328 = vrsqrt.f32 %v741_v18  ;;  %v725_v19 = vrot.slane %v724_v37, 1  ;;  %v730_v39 = vrot.slane %v729_v38, 4  ;;  %v785_v18 = vld [vmem:[#allocation6 + $0x60] sm:$0xff] }
 0x322   : > { %v748_v40 = vmul.f32 %v2327_v15, %v2858_v17  ;;  %v749_v41 = vmul.f32 %v2327_v15, %v2855_v16  ;;  %v750_v16 = vmul.f32 %v2327_v15, %v2862_v21  ;;  %1987 = vmatprep.mubr.msk.f32.mxu1 %vm845_vm15, %v785_v18  ;;  %v775_v15 = vld [vmem:[#allocation6 + $0x18] sm:$0xff] }
 0x323   : > { %v726_v42 = vadd.f32 %v725_v19, %v724_v37  ;;  %v731_v43 = vadd.f32 %v730_v39, %v729_v38  ;;  %v776_v19 = vld [vmem:[#allocation6 + $0x20] sm:$0xff]  ;;  %v777_v39 = vld [vmem:[#allocation6 + $0x28] sm:$0xff] }
 0x324   : > { %v760_v44 = vmax.f32 %v748_v40, 0.0  ;;  %v761_v45 = vmax.f32 %v749_v41, 0.0  ;;  %v762_v62 = vmax.f32 %v750_v16, 0.0  ;;  %v778_v40 = vld [vmem:[#allocation6 + $0x30] sm:$0xff]  ;;  %v779_v41 = vld [vmem:[#allocation6 + $0x38] sm:$0xff] }
 0x325   : > { %v738_v46 = vmul.f32 0.055555556, %v726_v42  ;;  %v732_v47 = vrot.slane %v731_v43, 2  ;;  %v780_v42 = vld [vmem:[#allocation6 + $0x40] sm:$0xff] }
 0x326   : > { %v2956_v48 = vpack.i.bf16 %v761_v45, %v760_v44  ;;  %v2113_v49 = vpack.c.bf16 %v761_v45, %v760_v44  ;;  %v782_v44 = vld [vmem:[#allocation6 + $0x50] sm:$0xff]  ;;  %v783_v45 = vld [vmem:[#allocation6 + $0x58] sm:$0xff] }
 0x327   : > { %v742_v53 = vadd.f32 1e-05, %v738_v46  ;;  %v733_v54 = vadd.f32 %v732_v47, %v731_v43  ;;  %v781_v43 = vld [vmem:[#allocation6 + $0x48] sm:$0xff]  ;;  %v1169_v46 = vld [vmem:[#allocation6 + $0xc0] sm:$0xff] }
 0x328   : > { %2265 = vrot.lane.b32.xlu1 %v2956_v48, %s2479_s8  ;;  %2114 = vmatprep.subr.bf16.mxu0 %v2113_v49  ;;  %v1880_v47 = vld [vmem:[%s3250_s2] ss:$0 sm:$0xff] }
 0x329   : > { %2330 = vrsqrt.f32 %v742_v53  ;;  %v734_v55 = vrot.slane %v733_v54, 1  ;;  %2116 = vmatpush3.bf16.msra.mxu0 %v2113_v49  ;;  %v2481_v49 = vmov 0   ;;  %v1883_v53 = vld [vmem:[%s3250_s2 + $0x3] ss:$0 sm:$0xff] }
 0x32a   : > { %2324 = vset.pattern.permute.xlu0 %v2481_v49  ;;  %2325 = vset.pattern.permute.xlu1 %v2481_v49  ;;  %v792_v49 = vld [vmem:[#allocation6 + $0x98] sm:$0xff] }
 0x32b   : > { %v2329_v17 = vpop.eup %2328  ;;  %v735_v56 = vadd.f32 %v734_v55, %v733_v54  ;;  %v1882_v54 = vld [vmem:[%s3250_s2 + $0x2] ss:$0 sm:$0xff] }
 0x32c   : > { %v752_v57 = vmul.f32 %v2329_v17, %v2877_v50  ;;  %v753_v58 = vmul.f32 %v2329_v17, %v2883_v52  ;;  %v751_v25 = vmul.f32 %v2329_v17, %v2880_v51 }
 0x32d   : > { %v739_v24 = vmul.f32 0.055555556, %v735_v56 }
 0x32e   : > { %v764_v26 = vmax.f32 %v752_v57, 0.0  ;;  %v765_v59 = vmax.f32 %v753_v58, 0.0  ;;  %v763_v63 = vmax.f32 %v751_v25, 0.0 }
 0x32f   : > { %v743_v0 = vadd.f32 1e-05, %v739_v24 }
 0x330   : > { %v2274_v10 = vpack.i.bf16 %v765_v59, %v764_v26  ;;  %v2269_v31 = vpack.i.bf16 %v763_v63, %v762_v62  ;;  %v2117_v32 = vpack.c.bf16 %v763_v63, %v762_v62  ;;  %v2121_v50 = vpack.c.bf16 %v765_v59, %v764_v26 }
 0x331   : > { %2332 = vrsqrt.f32 %v743_v0 }
 0x332   : > { %2275 = vrot.lane.b32.xlu1 %v2274_v10, %s2479_s8  ;;  %2270 = vrot.lane.b32.xlu0 %v2269_v31, %s2479_s8 }
 0x333   : > { %v2331_v21 = vpop.eup %2330  ;;  %2118 = vmatprep.subr.bf16.mxu0 %v2117_v32 }
 0x334   : > { %2120 = vmatpush3.bf16.msra.mxu0 %v2117_v32  ;;  %v754_v51 = vmul.f32 %v2331_v21, %v2898_v61  ;;  %v755_v52 = vmul.f32 %v2331_v21, %v2895_v60  ;;  %v756_v20 = vmul.f32 %v2331_v21, %v2905_v9 }
 0x335   : > { %2122 = vmatprep.subr.bf16.mxu0 %v2121_v50 }
 0x336   : > { %v766_v33 = vmax.f32 %v754_v51, 0.0  ;;  %v767_v13 = vmax.f32 %v755_v52, 0.0  ;;  %v768_v29 = vmax.f32 %v756_v20, 0.0 }
 0x338   : > { %2124 = vmatpush3.bf16.msra.mxu0 %v2121_v50  ;;  %v2279_v35 = vpack.i.bf16 %v767_v13, %v766_v33  ;;  %v2125_v34 = vpack.c.bf16 %v767_v13, %v766_v33 }
 0x33a   : > { %2280 = vrot.lane.b32.xlu1 %v2279_v35, %s2479_s8  ;;  %2126 = vmatprep.subr.bf16.mxu0 %v2125_v34 }
 0x33b   : > { %v2333_v22 = vpop.eup %2332 }
 0x33c   : > { %2128 = vmatpush3.bf16.msra.mxu0 %v2125_v34  ;;  %v758_v27 = vmul.f32 %v2333_v22, %v2913_v11  ;;  %v759_v61 = vmul.f32 %v2333_v22, %v2923_v14  ;;  %v757_v60 = vmul.f32 %v2333_v22, %v2916_v12  ;;  %v773_v12 = vld [vmem:[#allocation6 + $0x8] sm:$0xff]  ;;  %v774_v14 = vld [vmem:[#allocation6 + $0x10] sm:$0xff] }
 0x33e   : > { %v770_v36 = vmax.f32 %v758_v27, 0.0  ;;  %v771_v28 = vmax.f32 %v759_v61, 0.0  ;;  %v769_v30 = vmax.f32 %v757_v60, 0.0 }
 0x340   : > { %v2289_v37 = vpack.i.bf16 %v771_v28, %v770_v36  ;;  %v2284_v38 = vpack.i.bf16 %v769_v30, %v768_v29  ;;  %v2129_v9 = vpack.c.bf16 %v769_v30, %v768_v29  ;;  %v2133_v11 = vpack.c.bf16 %v771_v28, %v770_v36 }
 0x342   : > { %2290 = vrot.lane.b32.xlu1 %v2289_v37, %s2479_s8  ;;  %2285 = vrot.lane.b32.xlu0 %v2284_v38, %s2479_s8 }
 0x343   : > { %2130 = vmatprep.subr.bf16.mxu0 %v2129_v9 }
 0x344   : > { %2132 = vmatpush3.bf16.msra.mxu0 %v2129_v9 }
 0x345   : > { %2134 = vmatprep.subr.bf16.mxu0 %v2133_v11 }
 0x346   : > { %2300 = vrot.lane.b32.xlu1 %v2269_v31, %s2480_s9  ;;  %2295 = vrot.lane.b32.xlu0 %v2956_v48, %s2480_s9  ;;  %v1881_v48 = vld [vmem:[%s3250_s2 + $0x1] ss:$0 sm:$0xff] }
 0x348   : > { %2136 = vmatpush3.bf16.msra.mxu0 %v2133_v11 }
 0x34a   : > { %2310 = vrot.lane.b32.xlu1 %v2279_v35, %s2480_s9  ;;  %2305 = vrot.lane.b32.xlu0 %v2274_v10, %s2480_s9 }
 0x34b   : > { %2030 = vmatmul.mubr.msk.f32.vlgmr.msra.gmra.mrb[0].mxu0 %vm845_vm15, %v773_v12 }
 0x34c   : > { %2032 = vmatprep.mubr.msk.f32.mxu0 %vm845_vm15, %v774_v14  ;;  %v787_v14 = vld [vmem:[#allocation6 + $0x70] sm:$0xff] }
 0x34e   : > { %2320 = vrot.lane.b32.xlu1 %v2289_v37, %s2480_s9  ;;  %2315 = vrot.lane.b32.xlu0 %v2284_v38, %s2480_s9  ;;  %v786_v38 = vld [vmem:[#allocation6 + $0x68] sm:$0xff] }
 0x34f   : > { %2033 = vmatmul.mubr.msk.f32.gmra.mrb[2].mxu0 %vm845_vm15, %v775_v15 }
 0x350   : > { %2035 = vmatprep.mubr.msk.f32.mxu0 %vm845_vm15, %v776_v19  ;;  %v788_v19 = vld [vmem:[#allocation6 + $0x78] sm:$0xff] }
 0x352   : > { %1415 = vperm.xlu0 %2324, %v1880_v47   ;;  %1419 = vperm.xlu1 %2325, %v1881_v48   ;;  %v791_v48 = vld [vmem:[#allocation6 + $0x90] sm:$0xff] }
 0x353   : > { %2036 = vmatmul.mubr.msk.f32.gmra.mrb[4].mxu0 %vm845_vm15, %v777_v39 }
 0x354   : > { %2038 = vmatprep.mubr.msk.f32.mxu0 %vm845_vm15, %v778_v40 }
 0x356   : > { %1427 = vperm.xlu0 %2324, %v1883_v53   ;;  %1423 = vperm.xlu1 %2325, %v1882_v54   ;;  %v793_v54 = vld [vmem:[#allocation6 + $0xa0] sm:$0xff] }
 0x357   : > { %2039 = vmatmul.mubr.msk.f32.gmra.mrb[6].mxu0 %vm845_vm15, %v779_v41 }
 0x358   : > { %2041 = vmatprep.mubr.msk.f32.mxu0 %vm845_vm15, %v780_v42  ;;  %v789_v42 = vld [vmem:[#allocation6 + $0x80] sm:$0xff] }
 0x35b   : > { %2042 = vmatmul.mubr.msk.f32.gmra.mrb[8].mxu0 %vm845_vm15, %v781_v43 }
 0x35c   : > { %2044 = vmatprep.mubr.msk.f32.mxu0 %vm845_vm15, %v782_v44  ;;  %v790_v44 = vld [vmem:[#allocation6 + $0x88] sm:$0xff] }
 0x35f   : > { %2045 = vmatmul.mubr.msk.f32.gmra.mrb[10].mxu0 %vm845_vm15, %v783_v45 }
 0x360   : > { %2071 = vmatprep.mubr.msk.f32.mxu0 %vm845_vm15, %v1169_v46 }
 0x39a   : > { %v2266_v55 = vpop.permute.xlu1 %2265 }
 0x39b   : > { %v2268_v16 = vunpack.i.h.bf16 %v2266_v55  ;;  %v2267_v17 = vunpack.i.l.bf16 %v2266_v55  ;;  %v794_v55 = vld [vmem:[#allocation6 + $0xa8] sm:$0xff] }
 0x39d   : > { %v2089_v56 = vpack.c.bf16 %v2268_v16, %v2267_v17  ;;  %v795_v16 = vld [vmem:[#allocation6 + $0xb0] sm:$0xff]  ;;  %v796_v17 = vld [vmem:[#allocation6 + $0xb8] sm:$0xff] }
 0x39f   : > { %2090 = vmatprep.subr.bf16.mxu1 %v2089_v56 }
 0x3a0   : > { %2092 = vmatpush3.bf16.msra.mxu1 %v2089_v56  ;;  %v1170_v56 = vld [vmem:[#allocation6 + $0xc8] sm:$0xff] }
 0x3a4   : > { %v2276_v57 = vpop.permute.xlu1 %2275  ;;  %v2271_v58 = vpop.permute.xlu0 %2270 }
 0x3a5   : > { %v2278_v25 = vunpack.i.h.bf16 %v2276_v57  ;;  %v2277_v24 = vunpack.i.l.bf16 %v2276_v57  ;;  %v2273_v26 = vunpack.i.h.bf16 %v2271_v58  ;;  %v2272_v59 = vunpack.i.l.bf16 %v2271_v58  ;;  %v1171_v57 = vld [vmem:[#allocation6 + $0xd0] sm:$0xff] }
 0x3a6   : > { %v1175_v58 = vld [vmem:[#allocation6 + $0xf0] sm:$0xff] }
 0x3a7   : > { %v2093_v62 = vpack.c.bf16 %v2273_v26, %v2272_v59  ;;  %v2097_v63 = vpack.c.bf16 %v2278_v25, %v2277_v24  ;;  %v1172_v25 = vld [vmem:[#allocation6 + $0xd8] sm:$0xff]  ;;  %v1173_v26 = vld [vmem:[#allocation6 + $0xe0] sm:$0xff] }
 0x3a8   : > { %v1176_v24 = vld [vmem:[#allocation6 + $0xf8] sm:$0xff]  ;;  %v1177_v59 = vld [vmem:[#allocation6 + $0x100] sm:$0xff] }
 0x3a9   : > { %2094 = vmatprep.subr.bf16.mxu1 %v2093_v62 }
 0x3aa   : > { %2096 = vmatpush3.bf16.msra.mxu1 %v2093_v62  ;;  %v1174_v62 = vld [vmem:[#allocation6 + $0xe8] sm:$0xff] }
 0x3ab   : > { %2098 = vmatprep.subr.bf16.mxu1 %v2097_v63 }
 0x3ac   : > { %v2281_v0 = vpop.permute.xlu1 %2280 }
 0x3ad   : > { %v2283_v10 = vunpack.i.h.bf16 %v2281_v0  ;;  %v2282_v31 = vunpack.i.l.bf16 %v2281_v0  ;;  %v1179_v0 = vld [vmem:[#allocation6 + $0x110] sm:$0xff] }
 0x3ae   : > { %2100 = vmatpush3.bf16.msra.mxu1 %v2097_v63  ;;  %v1178_v63 = vld [vmem:[#allocation6 + $0x108] sm:$0xff] }
 0x3af   : > { %v2101_v32 = vpack.c.bf16 %v2283_v10, %v2282_v31  ;;  %v1180_v10 = vld [vmem:[#allocation6 + $0x118] sm:$0xff] }
 0x3b1   : > { %2102 = vmatprep.subr.bf16.mxu1 %v2101_v32 }
 0x3b2   : > { %2104 = vmatpush3.bf16.msra.mxu1 %v2101_v32 }
 0x3b4   : > { %v2291_v21 = vpop.permute.xlu1 %2290  ;;  %v2286_v50 = vpop.permute.xlu0 %2285 }
 0x3b5   : > { %v2293_v51 = vunpack.i.h.bf16 %v2291_v21  ;;  %v2292_v52 = vunpack.i.l.bf16 %v2291_v21  ;;  %v2288_v33 = vunpack.i.h.bf16 %v2286_v50  ;;  %v2287_v13 = vunpack.i.l.bf16 %v2286_v50 }
 0x3b7   : > { %v2105_v35 = vpack.c.bf16 %v2288_v33, %v2287_v13  ;;  %v2109_v34 = vpack.c.bf16 %v2293_v51, %v2292_v52 }
 0x3b8   : > { %v2301_v20 = vpop.permute.xlu1 %2300  ;;  %v2296_v22 = vpop.permute.xlu0 %2295 }
 0x3b9   : > { %v2303_v23 = vunpack.i.h.bf16 %v2301_v20  ;;  %v2302_v27 = vunpack.i.l.bf16 %v2301_v20  ;;  %v2298_v61 = vunpack.i.h.bf16 %v2296_v22  ;;  %v2297_v60 = vunpack.i.l.bf16 %v2296_v22  ;;  %2106 = vmatprep.subr.bf16.mxu1 %v2105_v35 }
 0x3ba   : > { %2108 = vmatpush3.bf16.msra.mxu1 %v2105_v35 }
 0x3bb   : > { %v2137_v36 = vpack.c.bf16 %v2298_v61, %v2297_v60  ;;  %2110 = vmatprep.subr.bf16.mxu1 %v2109_v34  ;;  %v2141_v29 = vpack.c.bf16 %v2303_v23, %v2302_v27 }
 0x3bc   : > { %v2306_v28 = vpop.permute.xlu0 %2305  ;;  %v2311_v37 = vpop.permute.xlu1 %2310 }
 0x3bd   : > { %v2308_v30 = vunpack.i.h.bf16 %v2306_v28  ;;  %v2307_v18 = vunpack.i.l.bf16 %v2306_v28  ;;  %2138 = vmatprep.subr.bf16.mxu0 %v2137_v36  ;;  %v2313_v9 = vunpack.i.h.bf16 %v2311_v37  ;;  %v2312_v11 = vunpack.i.l.bf16 %v2311_v37 }
 0x3be   : > { %2112 = vmatpush3.bf16.msra.mxu1 %v2109_v34  ;;  %2140 = vmatpush3.bf16.msra.mxu0 %v2137_v36 }
 0x3bf   : > { %2161 = vmatprep.subr.bf16.mxu1 %v2137_v36  ;;  %2142 = vmatprep.subr.bf16.mxu0 %v2141_v29  ;;  %v2145_v12 = vpack.c.bf16 %v2308_v30, %v2307_v18  ;;  %v2149_v39 = vpack.c.bf16 %v2313_v9, %v2312_v11 }
 0x3c0   : > { %v2316_v15 = vpop.permute.xlu0 %2315  ;;  %v2321_v43 = vpop.permute.xlu1 %2320 }
 0x3c1   : > { %1988 = vmatmul.mubr.msk.f32.vlgmr.msra.gmra.mrb[0].mxu1 %vm845_vm15, %v786_v38  ;;  %v2318_v40 = vunpack.i.h.bf16 %v2316_v15  ;;  %v2317_v41 = vunpack.i.l.bf16 %v2316_v15  ;;  %v2323_v45 = vunpack.i.h.bf16 %v2321_v43  ;;  %v2322_v46 = vunpack.i.l.bf16 %v2321_v43 }
 0x3c2   : > { %2167 = vmatpush3.bf16.msra.mxu1 %v2137_v36  ;;  %2144 = vmatpush3.bf16.msra.mxu0 %v2141_v29 }
 0x3c3   : > { %2162 = vmatprep.subr.bf16.mxu1 %v2141_v29  ;;  %2146 = vmatprep.subr.bf16.mxu0 %v2145_v12  ;;  %v2153_v47 = vpack.c.bf16 %v2318_v40, %v2317_v41  ;;  %v2157_v53 = vpack.c.bf16 %v2323_v45, %v2322_v46 }
 0x3c4   : > { %1990 = vmatprep.mubr.msk.f32.mxu1 %vm845_vm15, %v787_v14 }
 0x3c5   : > { %1991 = vmatmul.mubr.msk.f32.gmra.mrb[2].mxu1 %vm845_vm15, %v788_v19 }
 0x3c6   : > { %2168 = vmatpush3.bf16.msra.mxu1 %v2141_v29  ;;  %2148 = vmatpush3.bf16.msra.mxu0 %v2145_v12 }
 0x3c7   : > { %2163 = vmatprep.subr.bf16.mxu1 %v2145_v12  ;;  %2150 = vmatprep.subr.bf16.mxu0 %v2149_v39 }
 0x3c8   : > { %1993 = vmatprep.mubr.msk.f32.mxu1 %vm845_vm15, %v789_v42 }
 0x3c9   : > { %1994 = vmatmul.mubr.msk.f32.gmra.mrb[4].mxu1 %vm845_vm15, %v790_v44 }
 0x3ca   : > { %2169 = vmatpush3.bf16.msra.mxu1 %v2145_v12  ;;  %2152 = vmatpush3.bf16.msra.mxu0 %v2149_v39 }
 0x3cb   : > { %2164 = vmatprep.subr.bf16.mxu1 %v2149_v39  ;;  %2154 = vmatprep.subr.bf16.mxu0 %v2153_v47 }
 0x3cc   : > { %1996 = vmatprep.mubr.msk.f32.mxu1 %vm845_vm15, %v791_v48 }
 0x3cd   : > { %1997 = vmatmul.mubr.msk.f32.gmra.mrb[6].mxu1 %vm845_vm15, %v792_v49 }
 0x3ce   : > { %2170 = vmatpush3.bf16.msra.mxu1 %v2149_v39  ;;  %2156 = vmatpush3.bf16.msra.mxu0 %v2153_v47 }
 0x3cf   : > { %2165 = vmatprep.subr.bf16.mxu1 %v2153_v47  ;;  %2158 = vmatprep.subr.bf16.mxu0 %v2157_v53 }
 0x3d0   : > { %1999 = vmatprep.mubr.msk.f32.mxu1 %vm845_vm15, %v793_v54 }
 0x3d1   : > { %2000 = vmatmul.mubr.msk.f32.gmra.mrb[8].mxu1 %vm845_vm15, %v794_v55  ;;  %v1420_v18 = vpop.permute.xlu1 %1419  ;;  %v1416_v15 = vpop.permute.xlu0 %1415 }
 0x3d2   : > { %2171 = vmatpush3.bf16.msra.mxu1 %v2153_v47  ;;  %2160 = vmatpush3.bf16.msra.mxu0 %v2157_v53 }
 0x3d3   : > { %2166 = vmatprep.subr.bf16.mxu1 %v2157_v53  ;;  %2002 = vmatprep.mubr.msk.f32.mxu1 %vm845_vm15, %v795_v16 }
 0x3d5   : > { %2003 = vmatmul.mubr.msk.f32.gmra.mrb[10].mxu1 %vm845_vm15, %v796_v17  ;;  %2072 = vmatmul.mubr.msk.f32.vlgmr.msra.gmra.mrb[0].mxu0 %vm845_vm15, %v1170_v56  ;;  %v1424_v55 = vpop.permute.xlu1 %1423 }
 0x3d6   : > { %2172 = vmatpush3.bf16.msra.mxu1 %v2157_v53  ;;  %2074 = vmatprep.mubr.msk.f32.mxu0 %vm845_vm15, %v1171_v57 }
 0x3d7   : > { %2080 = vmatprep.mubr.msk.f32.mxu1 %vm845_vm15, %v1175_v58 }
 0x3d9   : > { %2075 = vmatmul.mubr.msk.f32.gmra.mrb[2].mxu0 %vm845_vm15, %v1172_v25  ;;  %2081 = vmatmul.mubr.msk.f32.vlgmr.msra.gmra.mrb[12].mxu1 %vm845_vm15, %v1176_v24 }
 0x3da   : > { %2077 = vmatprep.mubr.msk.f32.mxu0 %vm845_vm15, %v1173_v26  ;;  %2083 = vmatprep.mubr.msk.f32.mxu1 %vm845_vm15, %v1177_v59 }
 0x3dd   : > { %2078 = vmatmul.mubr.msk.f32.gmra.mrb[4].mxu0 %vm845_vm15, %v1174_v62  ;;  %2084 = vmatmul.mubr.msk.f32.gmra.mrb[14].mxu1 %vm845_vm15, %v1178_v63 }
 0x3de   : > { %2086 = vmatprep.mubr.msk.f32.mxu1 %vm845_vm15, %v1179_v0 }
 0x3e1   : > { %2087 = vmatmul.mubr.msk.f32.gmra.mrb[16].mxu1 %vm845_vm15, %v1180_v10 }
 0x42a   : > { %v2040_v31 = vpop.f32.mrb[6].mxu0 }
 0x42b   : > { %v1139_v32 = vpop.f32.mrb[7].mxu0 }
 0x42e   : > { %v2043_v21 = vpop.f32.mrb[8].mxu0 }
 0x42f   : > { %v1149_v50 = vpop.f32.mrb[9].mxu0 }
 0x432   : > { %v2046_v51 = vpop.f32.mrb[10].mxu0 }
 0x433   : > { %v1159_v52 = vpop.f32.mrb[11].mxu0 }
 0x494   : > { %v1989_v33 = vpop.f32.mrb[0].mxu1 }
 0x495   : > { %v948_v13 = vpop.f32.mrb[1].mxu1 }
 0x498   : > { %v1992_v35 = vpop.f32.mrb[2].mxu1 }
 0x499   : > { %v958_v34 = vpop.f32.mrb[3].mxu1 }
 0x49c   : > { %v1995_v20 = vpop.f32.mrb[4].mxu1 }
 0x49d   : > { %v968_v22 = vpop.f32.mrb[5].mxu1 }
 0x4a0   : > { %v1998_v23 = vpop.f32.mrb[6].mxu1 }
 0x4a1   : > { %v1145_v27 = vadd.f32 %v2040_v31, %v1998_v23  ;;  %v978_v61 = vpop.f32.mrb[7].mxu1 }
 0x4a2   : > { %v1140_v60 = vadd.f32 %v1139_v32, %v978_v61 }
 0x4a4   : > { %v2001_v36 = vpop.f32.mrb[8].mxu1 }
 0x4a5   : > { %v1155_v28 = vadd.f32 %v2043_v21, %v2001_v36  ;;  %v988_v29 = vpop.f32.mrb[9].mxu1 }
 0x4a6   : > { %v1150_v30 = vadd.f32 %v1149_v50, %v988_v29 }
 0x4a8   : > { %v2004_v37 = vpop.f32.mrb[10].mxu1  ;;  %v2073_v38 = vpop.f32.mrb[0].mxu0 }
 0x4a9   : > { %v1165_v9 = vadd.f32 %v2046_v51, %v2004_v37  ;;  %v2173_v11 = vadd.f32 %v2073_v38, %v1989_v33  ;;  %v998_v12 = vpop.f32.mrb[11].mxu1  ;;  %v1319_v14 = vpop.f32.mrb[1].mxu0 }
 0x4aa   : > { %v1160_v19 = vadd.f32 %v1159_v52, %v998_v12  ;;  %v2174_v39 = vadd.f32 %v1319_v14, %v948_v13  ;;  %v1428_v13 = vpop.permute.xlu0 %1427 }
 0x4ab   : > { %v3024_v40 = vadd.f32 %v2173_v11, %v1416_v15 }
 0x4ac   : > { %v2076_v41 = vpop.f32.mrb[2].mxu0  ;;  %v2082_v42 = vpop.f32.mrb[12].mxu1  ;;  %v3026_v43 = vadd.f32 %v2174_v39, %v1416_v15 }
 0x4ad   : > { %v2175_v44 = vadd.f32 %v2076_v41, %v1992_v35  ;;  %v1385_v45 = vadd.f32 %v2082_v42, %v1145_v27  ;;  %v1329_v46 = vpop.f32.mrb[3].mxu0  ;;  %v1349_v47 = vpop.f32.mrb[13].mxu1  ;;  %v1445_v48 = vsel %vm402_vm11, %v3024_v40, 0.0 }
 0x4ae   : > { %v2176_v49 = vadd.f32 %v1329_v46, %v958_v34  ;;  %v1384_v53 = vadd.f32 %v1349_v47, %v1140_v60  ;;  %1446 = vadd.xlane.f32.xlu0 %v1445_v48  ;;  %v1442_v54 = vsel %vm402_vm11, %v3026_v43, 0.0 }
 0x4af   : > { %1443 = vadd.xlane.f32.xlu1 %v1442_v54  ;;  %v3032_v16 = vadd.f32 %v2175_v44, %v1420_v18 }
 0x4b0   : > { %v2079_v17 = vpop.f32.mrb[4].mxu0  ;;  %v2085_v56 = vpop.f32.mrb[14].mxu1  ;;  %v3036_v59 = vadd.f32 %v2176_v49, %v1416_v15  ;;  %v3040_v31 = vadd.f32 %v1424_v55, %v1384_v53 }
 0x4b1   : > { %v2177_v57 = vadd.f32 %v2079_v17, %v1995_v20  ;;  %v1387_v58 = vadd.f32 %v2085_v56, %v1155_v28  ;;  %v1339_v25 = vpop.f32.mrb[5].mxu0  ;;  %v1359_v24 = vpop.f32.mrb[15].mxu1  ;;  %v1452_v26 = vsel %vm402_vm11, %v3032_v16, 0.0  ;;  %v3052_v20 = vadd.f32 %v1424_v55, %v1385_v45 }
 0x4b2   : > { %v2178_v62 = vadd.f32 %v1339_v25, %v968_v22  ;;  %v1386_v63 = vadd.f32 %v1359_v24, %v1150_v30  ;;  %1453 = vadd.xlane.f32.xlu0 %v1452_v26  ;;  %v1449_v50 = vsel %vm1448_vm0, %v3036_v59, 0.0  ;;  %v1461_v34 = vsel %vm402_vm11, %v3040_v31, 0.0 }
 0x4b3   : > { %v3038_v0 = vadd.f32 %v2177_v57, %v1420_v18  ;;  %v3054_v22 = vadd.f32 %v1428_v13, %v1387_v58  ;;  %v1464_v23 = vsel %vm402_vm11, %v3052_v20, 0.0 }
 0x4b4   : > { %v2088_v10 = vpop.f32.mrb[16].mxu1  ;;  %v3046_v52 = vadd.f32 %v2178_v62, %v1420_v18  ;;  %v3060_v61 = vadd.f32 %v1424_v55, %v1386_v63 }
 0x4b5   : > { %v1389_v32 = vadd.f32 %v2088_v10, %v1165_v9  ;;  %v1369_v21 = vpop.f32.mrb[17].mxu1  ;;  %v1458_v51 = vsel %vm1448_vm0, %v3038_v0, 0.0  ;;  %v1470_v27 = vsel %vm402_vm11, %v3054_v22, 0.0 }
 0x4b6   : > { %v1388_v33 = vadd.f32 %v1369_v21, %v1160_v19  ;;  %1450 = vadd.xlane.f32.xlu0 %v1449_v50  ;;  %1459 = vadd.xlane.f32.xlu1 %v1458_v51  ;;  %v1455_v35 = vsel %vm402_vm11, %v3046_v52, 0.0  ;;  %v1467_v36 = vsel %vm1448_vm0, %v3060_v61, 0.0 }
 0x4b7   : > { %v3068_v29 = vadd.f32 %v1428_v13, %v1389_v32 }
 0x4b8   : > { %v3062_v60 = vadd.f32 %v1428_v13, %v1388_v33 }
 0x4b9   : > { %v1476_v30 = vsel %vm1448_vm0, %v3068_v29, 0.0 }
 0x4ba   : > { %1456 = vadd.xlane.f32.xlu1 %v1455_v35  ;;  %1462 = vadd.xlane.f32.xlu0 %v1461_v34  ;;  %v1473_v28 = vsel %vm402_vm11, %v3062_v60, 0.0 }
 0x4be   : > { %1465 = vadd.xlane.f32.xlu1 %v1464_v23  ;;  %1471 = vadd.xlane.f32.xlu0 %v1470_v27 }
 0x4c2   : > { %1468 = vadd.xlane.f32.xlu0 %v1467_v36  ;;  %1474 = vadd.xlane.f32.xlu1 %v1473_v28 }
 0x4c6   : > { %1477 = vadd.xlane.f32.xlu1 %v1476_v30 }
 0x53b   : > { %v1447_v18 = vpop.xlane.xlu0 %1446 }
 0x53c   : > { %v1444_v37 = vpop.xlane.xlu1 %1443  ;;  %v1480_v9 = vmul.f32 0.055555556, %v1447_v18 }
 0x53d   : > { %v1479_v11 = vmul.f32 0.055555556, %v1444_v37 }
 0x53f   : > { %v1454_v38 = vpop.xlane.xlu0 %1453  ;;  %v1491_v19 = vadd.f32 %v1480_v9, %v1479_v11 }
 0x540   : > { %v1482_v46 = vmul.f32 0.055555556, %v1454_v38 }
 0x543   : > { %v1451_v12 = vpop.xlane.xlu0 %1450  ;;  %v1460_v14 = vpop.xlane.xlu1 %1459 }
 0x544   : > { %v1481_v15 = vmul.f32 0.055555556, %v1451_v12  ;;  %v1484_v42 = vmul.f32 0.055555556, %v1460_v14 }
 0x546   : > { %v1492_v39 = vsel %vm496_vm14, %v1481_v15, 0.0  ;;  %v1501_v54 = vsel %vm496_vm14, %v1484_v42, 0.0 }
 0x547   : > { %v1493_v41 = vadd.f32 %v1492_v39, %v1491_v19  ;;  %v1457_v44 = vpop.xlane.xlu1 %1456  ;;  %v1463_v45 = vpop.xlane.xlu0 %1462 }
 0x548   : > { %v1483_v47 = vmul.f32 0.055555556, %v1457_v44  ;;  %v1485_v26 = vmul.f32 0.055555556, %v1463_v45 }
 0x549   : > { %v1494_v48 = vrot.slane %v1493_v41, 4 }
 0x54a   : > { %v1500_v49 = vadd.f32 %v1483_v47, %v1482_v46 }
 0x54b   : > { %v1495_v53 = vadd.f32 %v1494_v48, %v1493_v41  ;;  %v1466_v55 = vpop.xlane.xlu1 %1465  ;;  %v1472_v17 = vpop.xlane.xlu0 %1471 }
 0x54c   : > { %v1502_v56 = vadd.f32 %v1501_v54, %v1500_v49  ;;  %v1486_v58 = vmul.f32 0.055555556, %v1466_v55  ;;  %v1488_v35 = vmul.f32 0.055555556, %v1472_v17 }
 0x54d   : > { %v1496_v57 = vrot.slane %v1495_v53, 2 }
 0x54e   : > { %v1503_v25 = vrot.slane %v1502_v56, 4  ;;  %v1509_v50 = vadd.f32 %v1486_v58, %v1485_v26 }
 0x54f   : > { %v1497_v24 = vadd.f32 %v1496_v57, %v1495_v53  ;;  %v1469_v62 = vpop.xlane.xlu0 %1468  ;;  %v1475_v63 = vpop.xlane.xlu1 %1474 }
 0x550   : > { %v1504_v10 = vadd.f32 %v1503_v25, %v1502_v56  ;;  %v1487_v32 = vmul.f32 0.055555556, %v1469_v62  ;;  %v1489_v51 = vmul.f32 0.055555556, %v1475_v63 }
 0x551   : > { %v1498_v21 = vrot.slane %v1497_v24, 1 }
 0x552   : > { %v1505_v33 = vrot.slane %v1504_v10, 2  ;;  %v1510_v13 = vsel %vm496_vm14, %v1487_v32, 0.0  ;;  %v1518_v18 = vadd.f32 %v1489_v51, %v1488_v35 }
 0x553   : > { %v1511_v34 = vadd.f32 %v1510_v13, %v1509_v50  ;;  %v1478_v23 = vpop.xlane.xlu1 %1477  ;;  %v1499_v27 = vadd.f32 %v1498_v21, %v1497_v24 }
 0x554   : > { %v1506_v36 = vadd.f32 %v1505_v33, %v1504_v10  ;;  %v1490_v28 = vmul.f32 0.055555556, %v1478_v23 }
 0x555   : > { %v1512_v30 = vrot.slane %v1511_v34, 4  ;;  %v1527_v37 = vmul.f32 0.055555556, %v1499_v27 }
 0x556   : > { %v1507_v38 = vrot.slane %v1506_v36, 1  ;;  %v1519_v9 = vsel %vm496_vm14, %v1490_v28, 0.0 }
 0x557   : > { %v1513_v11 = vadd.f32 %v1512_v30, %v1511_v34  ;;  %v1520_v12 = vadd.f32 %v1519_v9, %v1518_v18  ;;  %v3077_v14 = vsub.f32 %v3026_v43, %v1527_v37  ;;  %v3080_v15 = vsub.f32 %v3024_v40, %v1527_v37 }
 0x558   : > { %v3083_v19 = vsub.f32 %v3036_v59, %v1527_v37  ;;  %v1508_v39 = vadd.f32 %v1507_v38, %v1506_v36 }
 0x559   : > { %v1514_v41 = vrot.slane %v1513_v11, 2  ;;  %v1521_v42 = vrot.slane %v1520_v12, 4  ;;  %v1543_v44 = vmul.f32 %v3077_v14, %v3077_v14  ;;  %v1544_v45 = vmul.f32 %v3080_v15, %v3080_v15 }
 0x55a   : > { %v1545_v46 = vmul.f32 %v3083_v19, %v3083_v19  ;;  %v1528_v43 = vmul.f32 0.055555556, %v1508_v39 }
 0x55b   : > { %v1515_v47 = vadd.f32 %v1514_v41, %v1513_v11  ;;  %v1522_v48 = vadd.f32 %v1521_v42, %v1520_v12  ;;  %v1555_v40 = vsel %vm402_vm11, %v1543_v44, 0.0  ;;  %v1558_v59 = vsel %vm402_vm11, %v1544_v45, 0.0 }
 0x55c   : > { %1556 = vadd.xlane.f32.xlu0 %v1555_v40  ;;  %1559 = vadd.xlane.f32.xlu1 %v1558_v59  ;;  %v3094_v49 = vsub.f32 %v3046_v52, %v1528_v43  ;;  %v3097_v53 = vsub.f32 %v3032_v16, %v1528_v43  ;;  %v3100_v54 = vsub.f32 %v3038_v0, %v1528_v43  ;;  %v1561_v25 = vsel %vm1448_vm0, %v1545_v46, 0.0 }
 0x55d   : > { %v1516_v55 = vrot.slane %v1515_v47, 1  ;;  %v1523_v17 = vrot.slane %v1522_v48, 2 }
 0x55e   : > { %v1547_v56 = vmul.f32 %v3094_v49, %v3094_v49  ;;  %v1546_v24 = vmul.f32 %v3097_v53, %v3097_v53  ;;  %v1548_v16 = vmul.f32 %v3100_v54, %v3100_v54 }
 0x55f   : > { %v1517_v57 = vadd.f32 %v1516_v55, %v1515_v47  ;;  %v1524_v58 = vadd.f32 %v1523_v17, %v1522_v48 }
 0x560   : > { %1562 = vadd.xlane.f32.xlu0 %v1561_v25  ;;  %v1567_v52 = vsel %vm402_vm11, %v1547_v56, 0.0  ;;  %v1564_v63 = vsel %vm402_vm11, %v1546_v24, 0.0  ;;  %v1570_v21 = vsel %vm1448_vm0, %v1548_v16, 0.0 }
 0x561   : > { %v1529_v0 = vmul.f32 0.055555556, %v1517_v57  ;;  %v1525_v26 = vrot.slane %v1524_v58, 1  ;;  %1568 = vadd.xlane.f32.xlu1 %v1567_v52 }
 0x563   : > { %v1526_v62 = vadd.f32 %v1525_v26, %v1524_v58  ;;  %v3112_v10 = vsub.f32 %v3040_v31, %v1529_v0  ;;  %v3115_v32 = vsub.f32 %v3052_v20, %v1529_v0  ;;  %v3123_v13 = vsub.f32 %v3060_v61, %v1529_v0 }
 0x564   : > { %1565 = vadd.xlane.f32.xlu0 %v1564_v63 }
 0x565   : > { %v1530_v50 = vmul.f32 0.055555556, %v1526_v62  ;;  %1571 = vadd.xlane.f32.xlu1 %v1570_v21  ;;  %v1549_v51 = vmul.f32 %v3112_v10, %v3112_v10  ;;  %v1550_v33 = vmul.f32 %v3115_v32, %v3115_v32 }
 0x567   : > { %v1573_v31 = vsel %vm402_vm11, %v1549_v51, 0.0  ;;  %v1576_v35 = vsel %vm402_vm11, %v1550_v33, 0.0  ;;  %v3128_v20 = vsub.f32 %v3054_v22, %v1530_v50  ;;  %v3131_v34 = vsub.f32 %v3062_v60, %v1530_v50 }
 0x568   : > { %1574 = vadd.xlane.f32.xlu0 %v1573_v31  ;;  %v3134_v23 = vsub.f32 %v3068_v29, %v1530_v50  ;;  %v1551_v22 = vmul.f32 %v3123_v13, %v3123_v13 }
 0x569   : > { %1577 = vadd.xlane.f32.xlu1 %v1576_v35  ;;  %v1552_v27 = vmul.f32 %v3128_v20, %v3128_v20  ;;  %v1553_v61 = vmul.f32 %v3131_v34, %v3131_v34 }
 0x56a   : > { %v1554_v60 = vmul.f32 %v3134_v23, %v3134_v23  ;;  %v1579_v29 = vsel %vm1448_vm0, %v1551_v22, 0.0 }
 0x56b   : > { %v1582_v36 = vsel %vm402_vm11, %v1552_v27, 0.0  ;;  %v1585_v28 = vsel %vm402_vm11, %v1553_v61, 0.0 }
 0x56c   : > { %1583 = vadd.xlane.f32.xlu0 %v1582_v36  ;;  %v1588_v30 = vsel %vm1448_vm0, %v1554_v60, 0.0 }
 0x56d   : > { %1586 = vadd.xlane.f32.xlu1 %v1585_v28 }
 0x570   : > { %1580 = vadd.xlane.f32.xlu0 %v1579_v29 }
 0x571   : > { %1589 = vadd.xlane.f32.xlu1 %v1588_v30 }
 0x5e9   : > { %v1557_v18 = vpop.xlane.xlu0 %1556  ;;  %v1560_v37 = vpop.xlane.xlu1 %1559 }
 0x5ea   : > { %v1591_v38 = vmul.f32 0.055555556, %v1557_v18  ;;  %v1592_v9 = vmul.f32 0.055555556, %v1560_v37 }
 0x5ec   : > { %v1603_v41 = vadd.f32 %v1592_v9, %v1591_v38 }
 0x5ed   : > { %v1563_v11 = vpop.xlane.xlu0 %1562 }
 0x5ee   : > { %v1593_v12 = vmul.f32 0.055555556, %v1563_v11  ;;  %v1569_v39 = vpop.xlane.xlu1 %1568 }
 0x5ef   : > { %v1595_v46 = vmul.f32 0.055555556, %v1569_v39 }
 0x5f0   : > { %v1604_v42 = vsel %vm496_vm14, %v1593_v12, 0.0 }
 0x5f1   : > { %v1605_v44 = vadd.f32 %v1604_v42, %v1603_v41  ;;  %v1566_v45 = vpop.xlane.xlu0 %1565 }
 0x5f2   : > { %v1594_v43 = vmul.f32 0.055555556, %v1566_v45  ;;  %v1572_v47 = vpop.xlane.xlu1 %1571 }
 0x5f3   : > { %v1606_v48 = vrot.slane %v1605_v44, 4  ;;  %v1596_v40 = vmul.f32 0.055555556, %v1572_v47 }
 0x5f4   : > { %v1612_v59 = vadd.f32 %v1595_v46, %v1594_v43 }
 0x5f5   : > { %v1607_v55 = vadd.f32 %v1606_v48, %v1605_v44  ;;  %v1613_v17 = vsel %vm496_vm14, %v1596_v40, 0.0  ;;  %v1575_v56 = vpop.xlane.xlu0 %1574 }
 0x5f6   : > { %v1614_v57 = vadd.f32 %v1613_v17, %v1612_v59  ;;  %v1578_v58 = vpop.xlane.xlu1 %1577  ;;  %v1597_v63 = vmul.f32 0.055555556, %v1575_v56 }
 0x5f7   : > { %v1608_v25 = vrot.slane %v1607_v55, 2  ;;  %v1598_v21 = vmul.f32 0.055555556, %v1578_v58 }
 0x5f8   : > { %v1615_v24 = vrot.slane %v1614_v57, 4 }
 0x5f9   : > { %v1609_v52 = vadd.f32 %v1608_v25, %v1607_v55  ;;  %v1584_v16 = vpop.xlane.xlu0 %1583  ;;  %v1621_v22 = vadd.f32 %v1598_v21, %v1597_v63 }
 0x5fa   : > { %v1616_v0 = vadd.f32 %v1615_v24, %v1614_v57  ;;  %v1587_v26 = vpop.xlane.xlu1 %1586  ;;  %v1600_v51 = vmul.f32 0.055555556, %v1584_v16 }
 0x5fb   : > { %v1610_v62 = vrot.slane %v1609_v52, 1  ;;  %v1601_v33 = vmul.f32 0.055555556, %v1587_v26 }
 0x5fc   : > { %v1617_v50 = vrot.slane %v1616_v0, 2 }
 0x5fd   : > { %v1611_v31 = vadd.f32 %v1610_v62, %v1609_v52  ;;  %v1581_v35 = vpop.xlane.xlu0 %1580  ;;  %v1630_v30 = vadd.f32 %v1601_v33, %v1600_v51 }
 0x5fe   : > { %v1618_v27 = vadd.f32 %v1617_v50, %v1616_v0  ;;  %v1599_v61 = vmul.f32 0.055555556, %v1581_v35  ;;  %v1590_v36 = vpop.xlane.xlu1 %1589 }
 0x5ff   : > { %v1639_v28 = vmul.f32 0.055555556, %v1611_v31  ;;  %v1602_v60 = vmul.f32 0.055555556, %v1590_v36 }
 0x600   : > { %v1619_v29 = vrot.slane %v1618_v27, 1  ;;  %v1622_v18 = vsel %vm496_vm14, %v1599_v61, 0.0 }
 0x601   : > { %v1643_v37 = vadd.f32 1e-05, %v1639_v28  ;;  %v1623_v38 = vadd.f32 %v1622_v18, %v1621_v22  ;;  %v1631_v9 = vsel %vm496_vm14, %v1602_v60, 0.0 }
 0x602   : > { %v1620_v11 = vadd.f32 %v1619_v29, %v1618_v27  ;;  %v1632_v12 = vadd.f32 %v1631_v9, %v1630_v30 }
 0x603   : > { %2334 = vrsqrt.f32 %v1643_v37  ;;  %v1624_v39 = vrot.slane %v1623_v38, 4 }
 0x604   : > { %v1640_v41 = vmul.f32 0.055555556, %v1620_v11  ;;  %v1633_v42 = vrot.slane %v1632_v12, 4 }
 0x605   : > { %v1625_v44 = vadd.f32 %v1624_v39, %v1623_v38 }
 0x606   : > { %v1644_v45 = vadd.f32 1e-05, %v1640_v41  ;;  %v1634_v46 = vadd.f32 %v1633_v42, %v1632_v12 }
 0x607   : > { %v1626_v43 = vrot.slane %v1625_v44, 2 }
 0x608   : > { %2336 = vrsqrt.f32 %v1644_v45  ;;  %v1635_v47 = vrot.slane %v1634_v46, 2 }
 0x609   : > { %v1627_v48 = vadd.f32 %v1626_v43, %v1625_v44 }
 0x60a   : > { %v1636_v40 = vadd.f32 %v1635_v47, %v1634_v46 }
 0x60b   : > { %v1628_v59 = vrot.slane %v1627_v48, 1 }
 0x60c   : > { %v1637_v55 = vrot.slane %v1636_v40, 1 }
 0x60d   : > { %v2335_v17 = vpop.eup %2334  ;;  %v1629_v56 = vadd.f32 %v1628_v59, %v1627_v48 }
 0x60e   : > { %v1638_v57 = vadd.f32 %v1637_v55, %v1636_v40  ;;  %v1652_v58 = vmul.f32 %v2335_v17, %v3080_v15  ;;  %v1653_v25 = vmul.f32 %v2335_v17, %v3083_v19  ;;  %v1651_v24 = vmul.f32 %v2335_v17, %v3077_v14 }
 0x60f   : > { %v1641_v52 = vmul.f32 0.055555556, %v1629_v56 }
 0x610   : > { %v1642_v16 = vmul.f32 0.055555556, %v1638_v57  ;;  %v1676_v0 = vrot.slane %v1652_v58, 1  ;;  %v1678_v26 = vrot.slane %v1653_v25, 1  ;;  %v1675_v62 = vrot.slane %v1651_v24, 1 }
 0x611   : > { %v1645_v63 = vadd.f32 1e-05, %v1641_v52 }
 0x612   : > { %v2337_v21 = vpop.eup %2336  ;;  %v1646_v50 = vadd.f32 1e-05, %v1642_v16  ;;  %v1679_v51 = vsel %vm462_vm13, %v1676_v0, %v1678_v26  ;;  %v1677_v33 = vsel %vm462_vm13, %v1675_v62, %v1676_v0 }
 0x613   : > { %2338 = vrsqrt.f32 %v1645_v63  ;;  %1697 = vrot.lane.b32.xlu1 %v1679_v51, %s2479_s8  ;;  %1695 = vrot.lane.b32.xlu0 %v1677_v33, %s2479_s8  ;;  %v1655_v15 = vmul.f32 %v2337_v21, %v3094_v49  ;;  %v1656_v14 = vmul.f32 %v2337_v21, %v3100_v54  ;;  %v1654_v19 = vmul.f32 %v2337_v21, %v3097_v53 }
 0x614   : > { %2340 = vrsqrt.f32 %v1646_v50 }
 0x615   : > { %v1681_v31 = vrot.slane %v1655_v15, 1  ;;  %v1683_v35 = vrot.slane %v1656_v14, 1  ;;  %v1680_v27 = vrot.slane %v1654_v19, 1 }
 0x617   : > { %v1684_v61 = vsel %vm462_vm13, %v1681_v31, %v1683_v35  ;;  %v1682_v36 = vsel %vm462_vm13, %v1680_v27, %v1681_v31 }
 0x618   : > { %1701 = vrot.lane.b32.xlu0 %v1684_v61, %s2479_s8  ;;  %1699 = vrot.lane.b32.xlu1 %v1682_v36, %s2479_s8 }
 0x61d   : > { %v2339_v28 = vpop.eup %2338 }
 0x61e   : > { %v2341_v22 = vpop.eup %2340  ;;  %v1658_v49 = vmul.f32 %v2339_v28, %v3115_v32  ;;  %v1659_v54 = vmul.f32 %v2339_v28, %v3123_v13  ;;  %v1657_v53 = vmul.f32 %v2339_v28, %v3112_v10 }
 0x61f   : > { %v1661_v60 = vmul.f32 %v2341_v22, %v3131_v34  ;;  %v1662_v29 = vmul.f32 %v2341_v22, %v3134_v23  ;;  %v1660_v30 = vmul.f32 %v2341_v22, %v3128_v20 }
 0x620   : > { %v1686_v18 = vrot.slane %v1658_v49, 1  ;;  %v1688_v37 = vrot.slane %v1659_v54, 1  ;;  %v1685_v38 = vrot.slane %v1657_v53, 1 }
 0x621   : > { %v1691_v9 = vrot.slane %v1661_v60, 1  ;;  %v1693_v32 = vrot.slane %v1662_v29, 1  ;;  %v1690_v39 = vrot.slane %v1660_v30, 1 }
 0x622   : > { %v1689_v11 = vsel %vm462_vm13, %v1686_v18, %v1688_v37  ;;  %v1687_v12 = vsel %vm462_vm13, %v1685_v38, %v1686_v18 }
 0x623   : > { %1705 = vrot.lane.b32.xlu0 %v1689_v11, %s2479_s8  ;;  %1703 = vrot.lane.b32.xlu1 %v1687_v12, %s2479_s8  ;;  %v1694_v10 = vsel %vm462_vm13, %v1691_v9, %v1693_v32  ;;  %v1692_v13 = vsel %vm462_vm13, %v1690_v39, %v1691_v9 }
 0x627   : > { %1709 = vrot.lane.b32.xlu0 %v1694_v10, %s2479_s8  ;;  %1707 = vrot.lane.b32.xlu1 %v1692_v13, %s2479_s8  ;;  %s2482_s8 = smov [#allocation8]  }
 0x628   : > { %s2404_s9 = sshll.u32 %s2482_s8, 4  ;;  %s2405_s9 = int_to_ptr.vmem [resolvable:$false] %s2404_s9 }
 0x629   : > { %s2406_s4 = scalar_lea.vmem %s2405_s9, 2048  ;;  %p2407_p10 = scmp.lt.s32.totalorder %s3200_s7, %s2405_s9 }
 0x62a   : > { %p2408_p13 = scmp.lt.s32.totalorder %s2406_s4, %s2400_s20 }
 0x62c   : > { %p2409_p3 = por %p2408_p13, %p2407_p10 }
 0x62e   : > { %p2410_p7 = pnand %p2409_p3, %p2403_p8 }
 0x685   : > { %v1696_v20 = vpop.permute.xlu0 %1695  ;;  %v1698_v34 = vpop.permute.xlu1 %1697 }
 0x686   : > { %v1719_v23 = vadd.f32 %v1696_v20, %v2667_v1  ;;  %v1720_v41 = vadd.f32 %v1698_v34, %v2670_v2 }
 0x688   : > { %1728 = vst.msk [vmem:[%s203_s30] sm:$0xff] %vm1727_vm1, %v1719_v23  ;;  %1729 = vst.msk [vmem:[%s203_s30 + $0x8] sm:$0xff] %vm1727_vm1, %v1720_v41 }
 0x68a   : > { %v1702_v42 = vpop.permute.xlu0 %1701  ;;  %v1700_v44 = vpop.permute.xlu1 %1699 }
 0x68b   : > { %v1722_v45 = vadd.f32 %v1702_v42, %v2673_v3  ;;  %v1721_v46 = vadd.f32 %v1700_v44, %v2680_v4 }
 0x68d   : > { %1731 = vst.msk [vmem:[%s203_s30 + $0x18] sm:$0xff] %vm1727_vm1, %v1722_v45  ;;  %1730 = vst.msk [vmem:[%s203_s30 + $0x10] sm:$0xff] %vm1727_vm1, %v1721_v46 }
 0x695   : > { %v1706_v43 = vpop.permute.xlu0 %1705  ;;  %v1704_v1 = vpop.permute.xlu1 %1703 }
 0x696   : > { %v1724_v2 = vadd.f32 %v1706_v43, %v2683_v5  ;;  %v1723_v47 = vadd.f32 %v1704_v1, %v2698_v6 }
 0x698   : > { %1733 = vst.msk [vmem:[%s203_s30 + $0x28] sm:$0xff] %vm1727_vm1, %v1724_v2  ;;  %1732 = vst.msk [vmem:[%s203_s30 + $0x20] sm:$0xff] %vm1727_vm1, %v1723_v47 }
 0x699   : > { %v1710_v3 = vpop.permute.xlu0 %1709  ;;  %v1708_v4 = vpop.permute.xlu1 %1707 }
 0x69a   : > { %v1726_v5 = vadd.f32 %v1710_v3, %v2701_v7  ;;  %v1725_v6 = vadd.f32 %v1708_v4, %v2704_v8 }
 0x69c   : > { %1735 = vst.msk [vmem:[%s203_s30 + $0x38] sm:$0xff] %vm1727_vm1, %v1726_v5  ;;  %1734 = vst.msk [vmem:[%s203_s30 + $0x30] sm:$0xff] %vm1727_vm1, %v1725_v6 }
 0x69d   : > { %2413 = shalt.err (!%p2410_p7)
}
 0x69e   : > { %s2414_s25 = scalar_lea.hbm %s3198_s18, 1024  ;;  %s2418_s27 = scalar_lea.hbm %s3251_s3, 2048 }
 0x69f   : > { %p2415_p9 = scmp.ne.s32.totalorder %s3198_s18, %s2414_s25  ;;  %p2419_p5 = scmp.lt.u32.totalorder %s3198_s18, %s3251_s3 }
 0x6a0   : > { %p2420_p11 = scmp.lt.u32.totalorder %s2418_s27, %s2414_s25  ;;  %p2422_p4 = scmp.lt.u32.totalorder %s2414_s25, %s3198_s18 }
 0x6a1   : > { %p2416_p1 = pnand %p2415_p9, %p2599_p12 }
 0x6a2   : > { %p2421_p2 = por %p2420_p11, %p2419_p5 }
 0x6a3   : > { %p2417_p0 = pneg %p2416_p1 }
 0x6a4   : > { %p2423_p6 = por %p2422_p4, %p2421_p2 }
 0x6a6   : > { %p2424_p8 = pnand %p2423_p6, %p2417_p0 }
 0x6a8   : > { %2427 = shalt.err (!%p2424_p8)
}
 0x6a9   : > { %s2483_s29 = smov 128   ;;  %s2484_s30 = smov 8  }
 0x6aa   : > { %2203 = dma.vmem_to_hbm [thread:$0]  (%p2599_p12), %s3200_s7, 1024, %s3198_s18, %s1737_s16, %s2483_s29, %s2483_s29, %s2484_s30  }
 0x6ab PF: > { %s1765_s22 = sand.u32 1, %s2458_s12   ;;  %p3266_p10 = scmp.ne.s32.totalorder %s3256_s19, 0 }
 0x6ac   : > { %p3267_p13 = scmp.ge.s32.totalorder %s2470_s15, 2  ;;  %s1766_s10 = scalar_lea.sflag [#allocation5], %s1765_s22 }
 0x6ae   : > { %p2214_p3 = pnand %p3267_p13, %p3266_p10 }
 0x6b0   : > { %2453 = dma.done.wait (!%p2214_p3), %s1766_s10, 1024  }
 0x6b1   : > { %2455 = vsyncadd (!%p2214_p3), %s1766_s10, 4294966272  ;;  %p17_p7 = scmp.ge.s32.totalorder %s2561_s24, 4   ;;  %s3268_s12 = smov %s2462_s13 }
 0x6b2   : > { %s3269_s13 = smov %s2466_s14  ;;  %s3270_s14 = smov %s2595_s17 }
 0x6b3   : > { %s3271_s15 = smov %s2561_s24  ;;  %19 = sbr.rel (!%p17_p7) target bundleno = 6 (0x6), region = 83 }
 0x6ba   :  { %1771 = vsyncpa [#allocation4], 1 }
 0x6bb   :  { %1773 = vsyncpa [#allocation4 + $0x1], 1 }
 0x6bc   :  { %1774 = vsyncpa [#allocation7], 1 }
 0x6bd   :  { %1775 = vsyncpa [#allocation5], 1 }
 0x6be   :  { %1777 = vsyncpa [#allocation5 + $0x1], 1 }

</bundles_post_ra>
